<compile_context>
chip_gen: v5e
topology: v5e:2x2
jax: 0.10.0
libtpu: 0.0.40
codegen_flags: <defaults>
</compile_context>

<pallas_src>
import functools

import jax
import jax.numpy as jnp
from jax.experimental import pallas as pl
from jax.experimental.pallas import tpu as pltpu

# ----------------------------- model hyper-params ---------------------------
B = 2            # batch
SIG_C = 4        # n_channels of raw signal
T = 64           # n_timesteps
IMG_C = 4        # in_channels fed to the "Unet" encoder
HEIGHT = 16      # spectrogram height produced by the feature extractor
HID = 8          # hidden channels in the synthetic encoder
N_CLASSES = 3    # BCEWithLogitsLoss(weight=[1,5,5]) implies 3 classes


# ----------------------------- fused Pallas kernel --------------------------
def _shift_cols(a, dw):
    """a[:, t] -> a[:, t + dw] with zero fill at the time boundary."""
    z = jnp.zeros((a.shape[0], 1), a.dtype)
    if dw < 0:
        return jnp.concatenate([z, a[:, :-1]], axis=1)
    return jnp.concatenate([a[:, 1:], z], axis=1)


def _conv3x3(a, w_ref, bias):
    """3x3 'same' conv over the (HEIGHT, T) grid, as 3 block-Toeplitz matmuls.

    a:     (C_in*HEIGHT, T) f32 activation slab (row = c*HEIGHT + h).
    w_ref: Ref (3, C_out*HEIGHT, C_in*HEIGHT) bf16 -- one matrix per width
           offset dw in (-1, 0, +1); the height offset is folded inside.
    bias:  (C_out*HEIGHT, 1) f32.
    """
    a_bf = a.astype(jnp.bfloat16)
    acc = jnp.dot(w_ref[1], a_bf, preferred_element_type=jnp.float32)
    acc = acc + jnp.dot(w_ref[0], _shift_cols(a_bf, -1),
                        preferred_element_type=jnp.float32)
    acc = acc + jnp.dot(w_ref[2], _shift_cols(a_bf, +1),
                        preferred_element_type=jnp.float32)
    return jnp.maximum(acc + bias, 0.0)


def _fused_forward_kernel(*refs, with_loss):
    if with_loss:
        (x_ref, lab_ref, wfe_ref, bfe_ref, w1_ref, b1_ref, w2_ref, b2_ref,
         w3_ref, b3_ref, wd_ref, bd_ref, wl_ref, logits_ref, loss_ref) = refs
    else:
        (x_ref, wfe_ref, bfe_ref, w1_ref, b1_ref, w2_ref, b2_ref,
         w3_ref, b3_ref, wd_ref, bd_ref, logits_ref) = refs

    # --- feature extractor: conv1d(SIG_C -> IMG_C*HEIGHT, k=3, pad=1) + ReLU
    x = x_ref[0]                                             # (SIG_C, T+2), time pre-padded
    xpatch = jnp.concatenate(
        [x[:, 0:T], x[:, 1:T + 1], x[:, 2:T + 2]], axis=0)   # (3*SIG_C, T)
    fe = jnp.dot(wfe_ref[...], xpatch, preferred_element_type=jnp.float32)
    a1 = jnp.maximum(fe + bfe_ref[...], 0.0)                 # (IMG_C*HEIGHT, T)

    # --- encoder (synthetic smp.Unet stand-in): 3x3 -> 3x3 -> 1x1 (classes=1)
    h1 = _conv3x3(a1, w1_ref, b1_ref[...])                   # (HID*HEIGHT, T)
    h2 = _conv3x3(h1, w2_ref, b2_ref[...])                   # (HID*HEIGHT, T)
    enc = jnp.dot(w3_ref[...], h2,
                  preferred_element_type=jnp.float32) + b3_ref[...]   # (HEIGHT, T)

    # --- decoder: per-timestep linear HEIGHT -> N_CLASSES
    logits_t = jnp.dot(wd_ref[...], enc,
                       preferred_element_type=jnp.float32) + bd_ref[...]   # (N_CLASSES, T)
    logits_ref[0] = logits_t

    # --- fused weighted BCE-with-logits (partial sum for this batch element)
    if with_loss:
        y = lab_ref[0]                                       # (N_CLASSES, T)
        z = logits_t
        per = jnp.maximum(z, 0.0) - z * y + jnp.log1p(jnp.exp(-jnp.abs(z)))
        weighted = per * wl_ref[...]                         # (N_CLASSES, 1) broadcast
        s = jnp.sum(weighted, axis=1, keepdims=True)
        s = jnp.sum(s, axis=0, keepdims=True)                # (1, 1)
        loss_ref[0] = s


# ----------------------------- wrapper ---------------------------------------
def _whole_array_spec(arr):
    nd = arr.ndim
    return pl.BlockSpec(arr.shape, lambda b: (0,) * nd)


def spec2dcnn_forward(kparams, x, labels=None):
    """x: (B, n_channels, n_timesteps) -> {'logits': (B, T, 3), ['loss': scalar]}"""
    Bb, _, Tt = x.shape
    assert Tt == T
    with_loss = labels is not None

    # API-boundary padding only; the padded signal is tiny.
    x_pad = jnp.pad(x.astype(jnp.float32), ((0, 0), (0, 0), (1, 1)))   # (B, SIG_C, T+2)

    weights = (kparams["w_fe"], kparams["b_fe"],
               kparams["w1"], kparams["b1"],
               kparams["w2"], kparams["b2"],
               kparams["w3"], kparams["b3"],
               kparams["w_dec"], kparams["b_dec"])

    in_arrays = [x_pad]
    in_specs = [pl.BlockSpec((1, SIG_C, T + 2), lambda b: (b, 0, 0))]
    if with_loss:
        labels_t = labels.astype(jnp.float32).transpose(0, 2, 1)       # (B, C, T)
        in_arrays.append(labels_t)
        in_specs.append(pl.BlockSpec((1, N_CLASSES, T), lambda b: (b, 0, 0)))
    in_arrays.extend(weights)
    in_specs.extend(_whole_array_spec(w) for w in weights)
    if with_loss:
        in_arrays.append(kparams["loss_weight"])
        in_specs.append(_whole_array_spec(kparams["loss_weight"]))

    out_shape = [jax.ShapeDtypeStruct((Bb, N_CLASSES, T), jnp.float32)]
    out_specs = [pl.BlockSpec((1, N_CLASSES, T), lambda b: (b, 0, 0))]
    if with_loss:
        out_shape.append(jax.ShapeDtypeStruct((Bb, 1, 1), jnp.float32))
        out_specs.append(pl.BlockSpec((1, 1, 1), lambda b: (b, 0, 0)))

    outs = pl.pallas_call(
        functools.partial(_fused_forward_kernel, with_loss=with_loss),
        out_shape=tuple(out_shape),
        grid=(Bb,),
        in_specs=in_specs,
        out_specs=tuple(out_specs),
        compiler_params=pltpu.CompilerParams(dimension_semantics=("parallel",)),
    )(*in_arrays)

    logits = jnp.transpose(outs[0], (0, 2, 1))               # (B, T, N_CLASSES)
    output = {"logits": logits}
    if with_loss:
        output["loss"] = jnp.sum(outs[1]) / float(Bb * T * N_CLASSES)
    return output


# ----------------------------- parameters ------------------------------------
def init_params(key):
    """Module-style parameters (PyTorch layouts)."""
    ks = jax.random.split(key, 5)
    s = 0.1
    return {
        # feature extractor: Conv1d(SIG_C, IMG_C*HEIGHT, k=3, pad=1) + ReLU
        "w_fe": s * jax.random.normal(ks[0], (IMG_C * HEIGHT, SIG_C, 3), jnp.float32),
        "b_fe": jnp.zeros((IMG_C * HEIGHT,), jnp.float32),
        # synthetic "Unet" encoder: Conv2d 3x3 -> 3x3 -> 1x1 (classes=1)
        "w_e1": s * jax.random.normal(ks[1], (HID, IMG_C, 3, 3), jnp.float32),
        "b_e1": jnp.zeros((HID,), jnp.float32),
        "w_e2": s * jax.random.normal(ks[2], (HID, HID, 3, 3), jnp.float32),
        "b_e2": jnp.zeros((HID,), jnp.float32),
        "w_e3": s * jax.random.normal(ks[3], (1, HID), jnp.float32),
        "b_e3": jnp.zeros((1,), jnp.float32),
        # decoder: per-timestep Linear(HEIGHT, N_CLASSES)
        "w_dec": s * jax.random.normal(ks[4], (N_CLASSES, HEIGHT), jnp.float32),
        "b_dec": jnp.zeros((N_CLASSES,), jnp.float32),
        # BCEWithLogitsLoss weight
        "loss_weight": jnp.array([1.0, 5.0, 5.0], jnp.float32),
    }


def _expand_conv3x3(w):
    """(C_out, C_in, 3, 3) conv weight -> (3, C_out*HEIGHT, C_in*HEIGHT) bf16.

    Leading index j corresponds to the width offset dw = j - 1; the height
    offset is folded into a block-Toeplitz structure (kron with a shifted
    identity) so the 3x3 conv becomes three plain MXU matmuls in the kernel.
    """
    c_out, c_in = w.shape[0], w.shape[1]
    mats = []
    for j in range(3):                      # dw = -1, 0, +1
        m = jnp.zeros((c_out * HEIGHT, c_in * HEIGHT), jnp.float32)
        for i in range(3):                  # dh = -1, 0, +1
            shift = jnp.eye(HEIGHT, HEIGHT, k=i - 1, dtype=jnp.float32)
            m = m + jnp.kron(w[:, :, i, j], shift)
        mats.append(m)
    return jnp.stack(mats, axis=0).astype(jnp.bfloat16)


def prepare_kernel_params(p):
    """One-time repack of module-style params into fused-kernel layouts."""
    return {
        # (IMG_C*HEIGHT, 3*SIG_C); columns ordered (k, c_in) to match the
        # in-kernel time-shift concatenation of the raw signal.
        "w_fe": p["w_fe"].transpose(0, 2, 1).reshape(IMG_C * HEIGHT, 3 * SIG_C),
        "b_fe": p["b_fe"].reshape(IMG_C * HEIGHT, 1),
        "w1": _expand_conv3x3(p["w_e1"]),
        "b1": jnp.repeat(p["b_e1"], HEIGHT).reshape(HID * HEIGHT, 1),
        "w2": _expand_conv3x3(p["w_e2"]),
        "b2": jnp.repeat(p["b_e2"], HEIGHT).reshape(HID * HEIGHT, 1),
        # 1x1 conv (HID -> 1): kron with identity keeps the height structure.
        "w3": jnp.kron(p["w_e3"], jnp.eye(HEIGHT, dtype=jnp.float32)),   # (HEIGHT, HID*HEIGHT)
        "b3": p["b_e3"].reshape(1, 1),
        "w_dec": p["w_dec"],                                             # (N_CLASSES, HEIGHT)
        "b_dec": p["b_dec"].reshape(N_CLASSES, 1),
        "loss_weight": p["loss_weight"].reshape(N_CLASSES, 1),
    }


# ----------------------------- main -------------------------------------------
if __name__ == "__main__":
    key = jax.random.PRNGKey(0)
    k_x, k_lbl, k_par = jax.random.split(key, 3)

    x = jax.random.normal(k_x, (B, SIG_C, T), jnp.float32)
    labels = (jax.random.uniform(k_lbl, (B, T, N_CLASSES)) > 0.7).astype(jnp.float32)

    params = init_params(k_par)
    kparams = prepare_kernel_params(params)     # one-time repack, outside the hot path

    fwd = jax.jit(spec2dcnn_forward)
    out = fwd(kparams, x, labels)
    jax.block_until_ready(out)

    assert out["logits"].shape == (B, T, N_CLASSES)
    assert out["loss"].shape == ()
    assert bool(jnp.isfinite(out["loss"]))

    # inference path (labels=None) reuses the same fused kernel without the loss
    fwd_nl = jax.jit(lambda p_, x_: spec2dcnn_forward(p_, x_))
    out_nl = fwd_nl(kparams, x)
    jax.block_until_ready(out_nl)
    assert out_nl["logits"].shape == (B, T, N_CLASSES)
    assert bool(jnp.allclose(out["logits"], out_nl["logits"], atol=1e-5))

    print("KERNEL_OK")
</pallas_src>

<mosaic_0001>
module attributes {stable_mosaic.version = 11 : i64} {
  func.func @_fused_forward_kernel(%arg0: i32, %arg1: memref<1x4x66xf32, #tpu.memory_space<vmem>>, %arg2: memref<1x3x64xf32, #tpu.memory_space<vmem>>, %arg3: memref<64x12xf32, #tpu.memory_space<vmem>>, %arg4: memref<64x1xf32, #tpu.memory_space<vmem>>, %arg5: memref<3x128x64xbf16, #tpu.memory_space<vmem>>, %arg6: memref<128x1xf32, #tpu.memory_space<vmem>>, %arg7: memref<3x128x128xbf16, #tpu.memory_space<vmem>>, %arg8: memref<128x1xf32, #tpu.memory_space<vmem>>, %arg9: memref<16x128xf32, #tpu.memory_space<vmem>>, %arg10: memref<1x1xf32, #tpu.memory_space<vmem>>, %arg11: memref<3x16xf32, #tpu.memory_space<vmem>>, %arg12: memref<3x1xf32, #tpu.memory_space<vmem>>, %arg13: memref<3x1xf32, #tpu.memory_space<vmem>>, %arg14: memref<1x3x64xf32, #tpu.memory_space<vmem>>, %arg15: memref<1x1x1xf32, #tpu.memory_space<vmem>>) attributes {dimension_semantics = [#tpu.dimension_semantics<parallel>], iteration_bounds = array<i64: 2>, scalar_prefetch = 0 : i64, scratch_operands = 0 : i64, tpu.core_type = #tpu.core_type<tc>, window_params = [{transform_indices = @transform_0, window_bounds = array<i64: 1, 4, 66>}, {transform_indices = @transform_1, window_bounds = array<i64: 1, 3, 64>}, {pipeline_mode = #tpu.pipeline_mode<synchronous>, transform_indices = @transform_2, window_bounds = array<i64: 64, 12>}, {pipeline_mode = #tpu.pipeline_mode<synchronous>, transform_indices = @transform_3, window_bounds = array<i64: 64, 1>}, {pipeline_mode = #tpu.pipeline_mode<synchronous>, transform_indices = @transform_4, window_bounds = array<i64: 3, 128, 64>}, {pipeline_mode = #tpu.pipeline_mode<synchronous>, transform_indices = @transform_5, window_bounds = array<i64: 128, 1>}, {pipeline_mode = #tpu.pipeline_mode<synchronous>, transform_indices = @transform_6, window_bounds = array<i64: 3, 128, 128>}, {pipeline_mode = #tpu.pipeline_mode<synchronous>, transform_indices = @transform_7, window_bounds = array<i64: 128, 1>}, {pipeline_mode = #tpu.pipeline_mode<synchronous>, transform_indices = @transform_8, window_bounds = array<i64: 16, 128>}, {pipeline_mode = #tpu.pipeline_mode<synchronous>, transform_indices = @transform_9, window_bounds = array<i64: 1, 1>}, {pipeline_mode = #tpu.pipeline_mode<synchronous>, transform_indices = @transform_10, window_bounds = array<i64: 3, 16>}, {pipeline_mode = #tpu.pipeline_mode<synchronous>, transform_indices = @transform_11, window_bounds = array<i64: 3, 1>}, {pipeline_mode = #tpu.pipeline_mode<synchronous>, transform_indices = @transform_12, window_bounds = array<i64: 3, 1>}, {transform_indices = @transform_13, window_bounds = array<i64: 1, 3, 64>}, {transform_indices = @transform_14, window_bounds = array<i64: 1, 1, 1>}]} {
    %c0 = arith.constant 0 : index
    %c0_0 = arith.constant 0 : index
    %c0_1 = arith.constant 0 : index
    %0 = vector.load %arg1[%c0, %c0_0, %c0_1] : memref<1x4x66xf32, #tpu.memory_space<vmem>>, vector<1x4x66xf32>
    %1 = vector.shape_cast %0 : vector<1x4x66xf32> to vector<4x66xf32>
    %2 = vector.extract_strided_slice %1 {offsets = [0, 0], sizes = [4, 64], strides = [1, 1]} : vector<4x66xf32> to vector<4x64xf32>
    %3 = vector.extract_strided_slice %1 {offsets = [0, 1], sizes = [4, 64], strides = [1, 1]} : vector<4x66xf32> to vector<4x64xf32>
    %4 = vector.extract_strided_slice %1 {offsets = [0, 2], sizes = [4, 64], strides = [1, 1]} : vector<4x66xf32> to vector<4x64xf32>
    %5 = tpu.concatenate %2, %3, %4 in 0 : vector<4x64xf32>, vector<4x64xf32>, vector<4x64xf32> -> vector<12x64xf32>
    %c0_2 = arith.constant 0 : index
    %c0_3 = arith.constant 0 : index
    %6 = vector.load %arg3[%c0_2, %c0_3] : memref<64x12xf32, #tpu.memory_space<vmem>>, vector<64x12xf32>
    %cst = arith.constant dense<0.000000e+00> : vector<64x64xf32>
    %7 = tpu.matmul %6, %5, %cst {dimension_numbers = #tpu.dot_dimension_numbers<[1], [0], [0], [1], [0, 0, 1, 1], [], []>} : vector<64x12xf32>, vector<12x64xf32>, vector<64x64xf32> -> vector<64x64xf32>
    %c0_4 = arith.constant 0 : index
    %c0_5 = arith.constant 0 : index
    %8 = vector.load %arg4[%c0_4, %c0_5] : memref<64x1xf32, #tpu.memory_space<vmem>>, vector<64x1xf32>
    %9 = vector.broadcast %8 : vector<64x1xf32> to vector<64x64xf32>
    %10 = arith.addf %7, %9 : vector<64x64xf32>
    %cst_6 = arith.constant 0.000000e+00 : f32
    %11 = vector.broadcast %cst_6 : f32 to vector<64x64xf32>
    %12 = arith.maximumf %10, %11 : vector<64x64xf32>
    %c0_7 = arith.constant 0 : index
    %c0_8 = arith.constant 0 : index
    %13 = vector.load %arg6[%c0_7, %c0_8] : memref<128x1xf32, #tpu.memory_space<vmem>>, vector<128x1xf32>
    %14 = arith.truncf %12 : vector<64x64xf32> to vector<64x64xbf16>
    %c1 = arith.constant 1 : index
    %c0_9 = arith.constant 0 : index
    %c0_10 = arith.constant 0 : index
    %15 = vector.load %arg5[%c1, %c0_9, %c0_10] : memref<3x128x64xbf16, #tpu.memory_space<vmem>>, vector<1x128x64xbf16>
    %16 = vector.shape_cast %15 : vector<1x128x64xbf16> to vector<128x64xbf16>
    %cst_11 = arith.constant dense<0.000000e+00> : vector<128x64xf32>
    %17 = tpu.matmul %16, %14, %cst_11 {dimension_numbers = #tpu.dot_dimension_numbers<[1], [0], [0], [1], [0, 0, 1, 1], [], []>} : vector<128x64xbf16>, vector<64x64xbf16>, vector<128x64xf32> -> vector<128x64xf32>
    %c0_12 = arith.constant 0 : index
    %c0_13 = arith.constant 0 : index
    %c0_14 = arith.constant 0 : index
    %18 = vector.load %arg5[%c0_12, %c0_13, %c0_14] : memref<3x128x64xbf16, #tpu.memory_space<vmem>>, vector<1x128x64xbf16>
    %19 = vector.shape_cast %18 : vector<1x128x64xbf16> to vector<128x64xbf16>
    %cst_15 = arith.constant 0.000000e+00 : bf16
    %20 = vector.broadcast %cst_15 : bf16 to vector<64x1xbf16>
    %21 = vector.extract_strided_slice %14 {offsets = [0, 0], sizes = [64, 63], strides = [1, 1]} : vector<64x64xbf16> to vector<64x63xbf16>
    %22 = tpu.concatenate %20, %21 in 1 : vector<64x1xbf16>, vector<64x63xbf16> -> vector<64x64xbf16>
    %cst_16 = arith.constant dense<0.000000e+00> : vector<128x64xf32>
    %23 = tpu.matmul %19, %22, %cst_16 {dimension_numbers = #tpu.dot_dimension_numbers<[1], [0], [0], [1], [0, 0, 1, 1], [], []>} : vector<128x64xbf16>, vector<64x64xbf16>, vector<128x64xf32> -> vector<128x64xf32>
    %24 = arith.addf %17, %23 : vector<128x64xf32>
    %c2 = arith.constant 2 : index
    %c0_17 = arith.constant 0 : index
    %c0_18 = arith.constant 0 : index
    %25 = vector.load %arg5[%c2, %c0_17, %c0_18] : memref<3x128x64xbf16, #tpu.memory_space<vmem>>, vector<1x128x64xbf16>
    %26 = vector.shape_cast %25 : vector<1x128x64xbf16> to vector<128x64xbf16>
    %cst_19 = arith.constant 0.000000e+00 : bf16
    %27 = vector.broadcast %cst_19 : bf16 to vector<64x1xbf16>
    %28 = vector.extract_strided_slice %14 {offsets = [0, 1], sizes = [64, 63], strides = [1, 1]} : vector<64x64xbf16> to vector<64x63xbf16>
    %29 = tpu.concatenate %28, %27 in 1 : vector<64x63xbf16>, vector<64x1xbf16> -> vector<64x64xbf16>
    %cst_20 = arith.constant dense<0.000000e+00> : vector<128x64xf32>
    %30 = tpu.matmul %26, %29, %cst_20 {dimension_numbers = #tpu.dot_dimension_numbers<[1], [0], [0], [1], [0, 0, 1, 1], [], []>} : vector<128x64xbf16>, vector<64x64xbf16>, vector<128x64xf32> -> vector<128x64xf32>
    %31 = arith.addf %24, %30 : vector<128x64xf32>
    %32 = vector.broadcast %13 : vector<128x1xf32> to vector<128x64xf32>
    %33 = arith.addf %31, %32 : vector<128x64xf32>
    %cst_21 = arith.constant 0.000000e+00 : f32
    %34 = vector.broadcast %cst_21 : f32 to vector<128x64xf32>
    %35 = arith.maximumf %33, %34 : vector<128x64xf32>
    %c0_22 = arith.constant 0 : index
    %c0_23 = arith.constant 0 : index
    %36 = vector.load %arg8[%c0_22, %c0_23] : memref<128x1xf32, #tpu.memory_space<vmem>>, vector<128x1xf32>
    %37 = arith.truncf %35 : vector<128x64xf32> to vector<128x64xbf16>
    %c1_24 = arith.constant 1 : index
    %c0_25 = arith.constant 0 : index
    %c0_26 = arith.constant 0 : index
    %38 = vector.load %arg7[%c1_24, %c0_25, %c0_26] : memref<3x128x128xbf16, #tpu.memory_space<vmem>>, vector<1x128x128xbf16>
    %39 = vector.shape_cast %38 : vector<1x128x128xbf16> to vector<128x128xbf16>
    %cst_27 = arith.constant dense<0.000000e+00> : vector<128x64xf32>
    %40 = tpu.matmul %39, %37, %cst_27 {dimension_numbers = #tpu.dot_dimension_numbers<[1], [0], [0], [1], [0, 0, 1, 1], [], []>} : vector<128x128xbf16>, vector<128x64xbf16>, vector<128x64xf32> -> vector<128x64xf32>
    %c0_28 = arith.constant 0 : index
    %c0_29 = arith.constant 0 : index
    %c0_30 = arith.constant 0 : index
    %41 = vector.load %arg7[%c0_28, %c0_29, %c0_30] : memref<3x128x128xbf16, #tpu.memory_space<vmem>>, vector<1x128x128xbf16>
    %42 = vector.shape_cast %41 : vector<1x128x128xbf16> to vector<128x128xbf16>
    %cst_31 = arith.constant 0.000000e+00 : bf16
    %43 = vector.broadcast %cst_31 : bf16 to vector<128x1xbf16>
    %44 = vector.extract_strided_slice %37 {offsets = [0, 0], sizes = [128, 63], strides = [1, 1]} : vector<128x64xbf16> to vector<128x63xbf16>
    %45 = tpu.concatenate %43, %44 in 1 : vector<128x1xbf16>, vector<128x63xbf16> -> vector<128x64xbf16>
    %cst_32 = arith.constant dense<0.000000e+00> : vector<128x64xf32>
    %46 = tpu.matmul %42, %45, %cst_32 {dimension_numbers = #tpu.dot_dimension_numbers<[1], [0], [0], [1], [0, 0, 1, 1], [], []>} : vector<128x128xbf16>, vector<128x64xbf16>, vector<128x64xf32> -> vector<128x64xf32>
    %47 = arith.addf %40, %46 : vector<128x64xf32>
    %c2_33 = arith.constant 2 : index
    %c0_34 = arith.constant 0 : index
    %c0_35 = arith.constant 0 : index
    %48 = vector.load %arg7[%c2_33, %c0_34, %c0_35] : memref<3x128x128xbf16, #tpu.memory_space<vmem>>, vector<1x128x128xbf16>
    %49 = vector.shape_cast %48 : vector<1x128x128xbf16> to vector<128x128xbf16>
    %cst_36 = arith.constant 0.000000e+00 : bf16
    %50 = vector.broadcast %cst_36 : bf16 to vector<128x1xbf16>
    %51 = vector.extract_strided_slice %37 {offsets = [0, 1], sizes = [128, 63], strides = [1, 1]} : vector<128x64xbf16> to vector<128x63xbf16>
    %52 = tpu.concatenate %51, %50 in 1 : vector<128x63xbf16>, vector<128x1xbf16> -> vector<128x64xbf16>
    %cst_37 = arith.constant dense<0.000000e+00> : vector<128x64xf32>
    %53 = tpu.matmul %49, %52, %cst_37 {dimension_numbers = #tpu.dot_dimension_numbers<[1], [0], [0], [1], [0, 0, 1, 1], [], []>} : vector<128x128xbf16>, vector<128x64xbf16>, vector<128x64xf32> -> vector<128x64xf32>
    %54 = arith.addf %47, %53 : vector<128x64xf32>
    %55 = vector.broadcast %36 : vector<128x1xf32> to vector<128x64xf32>
    %56 = arith.addf %54, %55 : vector<128x64xf32>
    %cst_38 = arith.constant 0.000000e+00 : f32
    %57 = vector.broadcast %cst_38 : f32 to vector<128x64xf32>
    %58 = arith.maximumf %56, %57 : vector<128x64xf32>
    %c0_39 = arith.constant 0 : index
    %c0_40 = arith.constant 0 : index
    %59 = vector.load %arg9[%c0_39, %c0_40] : memref<16x128xf32, #tpu.memory_space<vmem>>, vector<16x128xf32>
    %cst_41 = arith.constant dense<0.000000e+00> : vector<16x64xf32>
    %60 = tpu.matmul %59, %58, %cst_41 {dimension_numbers = #tpu.dot_dimension_numbers<[1], [0], [0], [1], [0, 0, 1, 1], [], []>} : vector<16x128xf32>, vector<128x64xf32>, vector<16x64xf32> -> vector<16x64xf32>
    %c0_42 = arith.constant 0 : index
    %c0_43 = arith.constant 0 : index
    %61 = vector.load %arg10[%c0_42, %c0_43] : memref<1x1xf32, #tpu.memory_space<vmem>>, vector<1x1xf32>
    %62 = vector.broadcast %61 : vector<1x1xf32> to vector<16x64xf32>
    %63 = arith.addf %60, %62 : vector<16x64xf32>
    %c0_44 = arith.constant 0 : index
    %c0_45 = arith.constant 0 : index
    %64 = vector.load %arg11[%c0_44, %c0_45] : memref<3x16xf32, #tpu.memory_space<vmem>>, vector<3x16xf32>
    %cst_46 = arith.constant dense<0.000000e+00> : vector<3x64xf32>
    %65 = tpu.matmul %64, %63, %cst_46 {dimension_numbers = #tpu.dot_dimension_numbers<[1], [0], [0], [1], [0, 0, 1, 1], [], []>} : vector<3x16xf32>, vector<16x64xf32>, vector<3x64xf32> -> vector<3x64xf32>
    %c0_47 = arith.constant 0 : index
    %c0_48 = arith.constant 0 : index
    %66 = vector.load %arg12[%c0_47, %c0_48] : memref<3x1xf32, #tpu.memory_space<vmem>>, vector<3x1xf32>
    %67 = vector.broadcast %66 : vector<3x1xf32> to vector<3x64xf32>
    %68 = arith.addf %65, %67 : vector<3x64xf32>
    %c0_49 = arith.constant 0 : index
    %c0_50 = arith.constant 0 : index
    %c0_51 = arith.constant 0 : index
    %69 = vector.load %arg14[%c0_49, %c0_50, %c0_51] : memref<1x3x64xf32, #tpu.memory_space<vmem>>, vector<1x3x64xf32>
    %70 = vector.shape_cast %69 : vector<1x3x64xf32> to vector<3x64xf32>
    %71 = vector.shape_cast %68 : vector<3x64xf32> to vector<1x3x64xf32>
    tpu.vector_store %arg14[%c0_49, %c0_50, %c0_51], %71 {strides = array<i32>} : memref<1x3x64xf32, #tpu.memory_space<vmem>>, vector<1x3x64xf32>,
    %c0_52 = arith.constant 0 : index
    %c0_53 = arith.constant 0 : index
    %c0_54 = arith.constant 0 : index
    %72 = vector.load %arg2[%c0_52, %c0_53, %c0_54] : memref<1x3x64xf32, #tpu.memory_space<vmem>>, vector<1x3x64xf32>
    %73 = vector.shape_cast %72 : vector<1x3x64xf32> to vector<3x64xf32>
    %cst_55 = arith.constant 0.000000e+00 : f32
    %74 = vector.broadcast %cst_55 : f32 to vector<3x64xf32>
    %75 = arith.maximumf %68, %74 : vector<3x64xf32>
    %76 = arith.mulf %68, %73 : vector<3x64xf32>
    %77 = arith.subf %75, %76 : vector<3x64xf32>
    %78 = math.absf %68 : vector<3x64xf32>
    %cst_56 = arith.constant 0.000000e+00 : f32
    %79 = vector.broadcast %cst_56 : f32 to vector<3x64xf32>
    %80 = arith.subf %79, %78 : vector<3x64xf32>
    %81 = math.exp %80 : vector<3x64xf32>
    %82 = math.log1p %81 : vector<3x64xf32>
    %83 = arith.addf %77, %82 : vector<3x64xf32>
    %c0_57 = arith.constant 0 : index
    %c0_58 = arith.constant 0 : index
    %84 = vector.load %arg13[%c0_57, %c0_58] : memref<3x1xf32, #tpu.memory_space<vmem>>, vector<3x1xf32>
    %85 = vector.broadcast %84 : vector<3x1xf32> to vector<3x64xf32>
    %86 = arith.mulf %83, %85 : vector<3x64xf32>
    %cst_59 = arith.constant dense<0.000000e+00> : vector<3xf32>
    %87 = vector.multi_reduction <add>, %86, %cst_59 [1] : vector<3x64xf32> to vector<3xf32>
    %88 = vector.shape_cast %87 : vector<3xf32> to vector<3x1xf32>
    %cst_60 = arith.constant dense<0.000000e+00> : vector<1xf32>
    %89 = vector.multi_reduction <add>, %88, %cst_60 [0] : vector<3x1xf32> to vector<1xf32>
    %90 = vector.shape_cast %89 : vector<1xf32> to vector<1x1xf32>
    %c0_61 = arith.constant 0 : index
    %c0_62 = arith.constant 0 : index
    %c0_63 = arith.constant 0 : index
    %91 = vector.load %arg15[%c0_61, %c0_62, %c0_63] : memref<1x1x1xf32, #tpu.memory_space<vmem>>, vector<1x1x1xf32>
    %92 = vector.shape_cast %91 : vector<1x1x1xf32> to vector<1x1xf32>
    %93 = vector.shape_cast %90 : vector<1x1xf32> to vector<1x1x1xf32>
    tpu.vector_store %arg15[%c0_61, %c0_62, %c0_63], %93 {strides = array<i32>} : memref<1x1x1xf32, #tpu.memory_space<vmem>>, vector<1x1x1xf32>,
    return
  }
  func.func @transform_0(%arg0: i32) -> (i32, i32, i32) {
    %c0_i32 = arith.constant 0 : i32
    %c0_i32_0 = arith.constant 0 : i32
    %c0_i32_1 = arith.constant 0 : i32
    return %arg0, %c0_i32, %c0_i32_0 : i32, i32, i32
  }
  func.func @transform_1(%arg0: i32) -> (i32, i32, i32) {
    %c0_i32 = arith.constant 0 : i32
    %c0_i32_0 = arith.constant 0 : i32
    %c0_i32_1 = arith.constant 0 : i32
    return %arg0, %c0_i32, %c0_i32_0 : i32, i32, i32
  }
  func.func @transform_2(%arg0: i32) -> (i32, i32) {
    %c0_i32 = arith.constant 0 : i32
    %c0_i32_0 = arith.constant 0 : i32
    %c0_i32_1 = arith.constant 0 : i32
    return %c0_i32, %c0_i32_0 : i32, i32
  }
  func.func @transform_3(%arg0: i32) -> (i32, i32) {
    %c0_i32 = arith.constant 0 : i32
    %c0_i32_0 = arith.constant 0 : i32
    %c0_i32_1 = arith.constant 0 : i32
    return %c0_i32, %c0_i32_0 : i32, i32
  }
  func.func @transform_4(%arg0: i32) -> (i32, i32, i32) {
    %c0_i32 = arith.constant 0 : i32
    %c0_i32_0 = arith.constant 0 : i32
    %c0_i32_1 = arith.constant 0 : i32
    %c0_i32_2 = arith.constant 0 : i32
    return %c0_i32, %c0_i32_0, %c0_i32_1 : i32, i32, i32
  }
  func.func @transform_5(%arg0: i32) -> (i32, i32) {
    %c0_i32 = arith.constant 0 : i32
    %c0_i32_0 = arith.constant 0 : i32
    %c0_i32_1 = arith.constant 0 : i32
    return %c0_i32, %c0_i32_0 : i32, i32
  }
  func.func @transform_6(%arg0: i32) -> (i32, i32, i32) {
    %c0_i32 = arith.constant 0 : i32
    %c0_i32_0 = arith.constant 0 : i32
    %c0_i32_1 = arith.constant 0 : i32
    %c0_i32_2 = arith.constant 0 : i32
    return %c0_i32, %c0_i32_0, %c0_i32_1 : i32, i32, i32
  }
  func.func @transform_7(%arg0: i32) -> (i32, i32) {
    %c0_i32 = arith.constant 0 : i32
    %c0_i32_0 = arith.constant 0 : i32
    %c0_i32_1 = arith.constant 0 : i32
    return %c0_i32, %c0_i32_0 : i32, i32
  }
  func.func @transform_8(%arg0: i32) -> (i32, i32) {
    %c0_i32 = arith.constant 0 : i32
    %c0_i32_0 = arith.constant 0 : i32
    %c0_i32_1 = arith.constant 0 : i32
    return %c0_i32, %c0_i32_0 : i32, i32
  }
  func.func @transform_9(%arg0: i32) -> (i32, i32) {
    %c0_i32 = arith.constant 0 : i32
    %c0_i32_0 = arith.constant 0 : i32
    %c0_i32_1 = arith.constant 0 : i32
    return %c0_i32, %c0_i32_0 : i32, i32
  }
  func.func @transform_10(%arg0: i32) -> (i32, i32) {
    %c0_i32 = arith.constant 0 : i32
    %c0_i32_0 = arith.constant 0 : i32
    %c0_i32_1 = arith.constant 0 : i32
    return %c0_i32, %c0_i32_0 : i32, i32
  }
  func.func @transform_11(%arg0: i32) -> (i32, i32) {
    %c0_i32 = arith.constant 0 : i32
    %c0_i32_0 = arith.constant 0 : i32
    %c0_i32_1 = arith.constant 0 : i32
    return %c0_i32, %c0_i32_0 : i32, i32
  }
  func.func @transform_12(%arg0: i32) -> (i32, i32) {
    %c0_i32 = arith.constant 0 : i32
    %c0_i32_0 = arith.constant 0 : i32
    %c0_i32_1 = arith.constant 0 : i32
    return %c0_i32, %c0_i32_0 : i32, i32
  }
  func.func @transform_13(%arg0: i32) -> (i32, i32, i32) {
    %c0_i32 = arith.constant 0 : i32
    %c0_i32_0 = arith.constant 0 : i32
    %c0_i32_1 = arith.constant 0 : i32
    return %arg0, %c0_i32, %c0_i32_0 : i32, i32, i32
  }
  func.func @transform_14(%arg0: i32) -> (i32, i32, i32) {
    %c0_i32 = arith.constant 0 : i32
    %c0_i32_0 = arith.constant 0 : i32
    %c0_i32_1 = arith.constant 0 : i32
    return %arg0, %c0_i32, %c0_i32_0 : i32, i32, i32
  }
}

</mosaic_0001>

<bundles_post_ra>
// kernel: spec2dcnn_forward.1
= control target key start
LH: loop header
LB: loop body
LE: loop exit
PB: predicated region body
PF: predicated region fallthrough
CT: control target
= control target key end

     0   :  { %s2555_s15 = smov 0   ;;  %s3086_s0 = inlined_call_operand.vmem [shape: f32[2,4,66], index: 0, kind: input, shape index: {}]   ;;  %s3087_s1 = inlined_call_operand.vmem [shape: f32[2,3,64], index: 1, kind: input, shape index: {}]   ;;  %s3088_s2 = inlined_call_operand.vmem [shape: f32[64,12], index: 2, kind: input, shape index: {}]   ;;  %s3089_s3 = inlined_call_operand.vmem [shape: f32[64,1], index: 3, kind: input, shape index: {}]   ;;  %s3090_s4 = inlined_call_operand.vmem [shape: bf16[3,128,64], index: 4, kind: input, shape index: {}]   ;;  %s3091_s5 = inlined_call_operand.vmem [shape: f32[128,1], index: 5, kind: input, shape index: {}]   ;;  %s3092_s6 = inlined_call_operand.vmem [shape: bf16[3,128,128], index: 6, kind: input, shape index: {}]   ;;  %s3093_s7 = inlined_call_operand.vmem [shape: f32[128,1], index: 7, kind: input, shape index: {}]   ;;  %s3094_s8 = inlined_call_operand.vmem [shape: f32[16,128], index: 8, kind: input, shape index: {}]   ;;  %s3095_s9 = inlined_call_operand.<no memory space> [shape: f32[1,1], index: 9, kind: input, shape index: {}]   ;;  %s3096_s10 = inlined_call_operand.vmem [shape: f32[3,16], index: 10, kind: input, shape index: {}]   ;;  %s3097_s11 = inlined_call_operand.vmem [shape: f32[3,1], index: 11, kind: input, shape index: {}]   ;;  %s3098_s12 = inlined_call_operand.vmem [shape: f32[3,1], index: 12, kind: input, shape index: {}]   ;;  %s3099_s13 = inlined_call_operand.vmem [shape: f32[2,3,64], index: 13, kind: output, shape index: {0}]   ;;  %s3100_s14 = inlined_call_operand.vmem [shape: f32[2,1,1], index: 14, kind: output, shape index: {1}]  }
   0x1   :  { %v20_v0 = vstv %s3095_s9 }
   0x2   :  { %21 = vst [vmem:[#allocation2] sm:$0x1] %v20_v0 }
   0x3 LB: > { %s2065_s16 = sadd.s32 4294967295, %s2471_s15   ;;  %p2069_p0 = scmp.ge.s32.totalorder %s2471_s15, 1  ;;  %s2471_s15 = sphi %s2555_s15, %s27_s15  }
   0x4   : > { %p425_p1 = scmp.lt.s32.totalorder %s2471_s15, 3 }
   0x6   : > { %p426_p2 = pnand %p2069_p0, %p425_p1 }
   0x7   : > { %p476_p3 = scmp.lt.s32.totalorder (!%p426_p2), %s2065_s16, 1  ;;  %s2473_s20 = smov (!%p426_p2), 126  }
   0x8   : > { %429 = sbr.rel (%p426_p2) target bundleno = 1610 (0x64a), region = 72  ;;  %s2474_s21 = smov (!%p426_p2), 127  }
   0x9   : > { %s2476_s28 = smov (!%p426_p2), 1  }
   0xd   : > { %s3104_s16 = smov (!%p476_p3, %s2065_s16), 1  ;;  %v516_v3 = vld [vmem:[%s3089_s3 + $0x30] sm:$0xff]  ;;  %v2475_v4 = vmov 0   ;;  %v517_v5 = vld [vmem:[%s3089_s3 + $0x38] sm:$0xff]  ;;  %v514_v7 = vld [vmem:[%s3089_s3 + $0x20] sm:$0xff]  ;;  %vm500_vm0 = vcmask 1043456  }
   0xe   : > { %s2566_s9 = sshll.u32 %s3104_s16, 2  ;;  %2457 = vset.pattern.permute.xlu1 %v2475_v4  ;;  %2458 = vset.pattern.permute.xlu2 %v2475_v4  ;;  %v513_v6 = vld [vmem:[%s3089_s3 + $0x18] sm:$0xff]  ;;  %v511_v8 = vld [vmem:[%s3089_s3 + $0x8] sm:$0xff]  ;;  %v512_v11 = vld [vmem:[%s3089_s3 + $0x10] sm:$0xff]  ;;  %vm558_vm1 = vcmask 97280   ;;  %vm773_vm2 = vcmask 523264   ;;  %s490_s24 = scalar_lea.vmem %s3100_s14, %s3104_s16 }
   0xf   : > { %s479_s19 = scalar_lea.vmem %s3086_s0, %s2566_s9  ;;  %550 = vperm.xlu1 %2457, %v516_v3   ;;  %2459 = vset.pattern.permute.xlu0 %v2475_v4  ;;  %v515_v10 = vld [vmem:[%s3089_s3 + $0x28] sm:$0xff]  ;;  %v502_v13 = vld [vmem:[%s3088_s2] sm:$0xff]  ;;  %v504_v17 = vld [vmem:[%s3088_s2 + $0x10] sm:$0xff]  ;;  %vm719_vm3 = vcmask 7168   ;;  %vm989_vm5 = vcmask 515072   ;;  %vm1911_vm6 = vcmask 130048   ;;  %s487_s18 = scalar_lea.vmem %s3099_s13, %s2566_s9 }
  0x10   : > { %v492_v1 = vld [vmem:[%s479_s19] sm:$0xf]  ;;  %540 = vperm.xlu2 %2458, %v514_v7   ;;  %v503_v16 = vld [vmem:[%s3088_s2 + $0x8] sm:$0xff]  ;;  %v505_v18 = vld [vmem:[%s3088_s2 + $0x18] sm:$0xff]  ;;  %vm1935_vm7 = vcmask 518144   ;;  %s483_s22 = scalar_lea.vmem %s3087_s1, %s2566_s9  ;;  %vm1965_vm9 = vcmask 1042432  }
  0x11   : > { %498 = vrot.lane.b32.xlu0 %v492_v1, %s2473_s20  ;;  %v494_v2 = vrot.slane %v492_v1, 4  ;;  %v510_v15 = vld [vmem:[%s3089_s3] sm:$0xff]  ;;  %v507_v20 = vld [vmem:[%s3088_s2 + $0x28] sm:$0xff]  ;;  %v508_v21 = vld [vmem:[%s3088_s2 + $0x30] sm:$0xff]  ;;  %vm1973_vm10 = vcmask 0  }
  0x12   : > { %v506_v19 = vld [vmem:[%s3088_s2 + $0x20] sm:$0xff]  ;;  %v509_v22 = vld [vmem:[%s3088_s2 + $0x38] sm:$0xff]  ;;  %v648_v59 = vld [vmem:[%s3091_s5 + $0x70] sm:$0xff] }
  0x13   : > { %vm2705_vm4 = vmneg %vm719_vm3 }
  0x17   : > { %555 = vperm.xlu1 %2457, %v517_v5  }
  0x18   : > { %545 = vperm.xlu2 %2458, %v515_v10  }
  0x19   : > { %495 = vrot.lane.b32.xlu0 %v494_v2, %s2474_s21 }
  0x1f   : > { %535 = vperm.xlu1 %2457, %v513_v6  }
  0x20   : > { %520 = vperm.xlu2 %2458, %v510_v15   ;;  %v646_v15 = vld [vmem:[%s3091_s5 + $0x60] sm:$0xff] }
  0x21   : > { %530 = vperm.xlu0 %2459, %v512_v11  }
  0x27   : > { %525 = vperm.xlu1 %2457, %v511_v8   ;;  %v647_v8 = vld [vmem:[%s3091_s5 + $0x68] sm:$0xff] }
  0x6a   : > { %v541_v37 = vpop.permute.xlu2 %540 }
  0x72   : > { %v546_v44 = vpop.permute.xlu2 %545 }
  0x7a   : > { %v521_v57 = vpop.permute.xlu2 %520 }
  0x81   : > { %v551_v24 = vpop.permute.xlu1 %550 }
  0x83   : > { %v499_v9 = vpop.permute.xlu0 %498 }
  0x84   : > { %2073 = vmatpush.msk.msra.mxu0 %vm500_vm0, %v499_v9 }
  0x89   : > { %v556_v26 = vpop.permute.xlu1 %555 }
  0x8b   : > { %v496_v12 = vpop.permute.xlu0 %495 }
  0x8c   : > { %v501_v14 = vsel %vm500_vm0, %v492_v1, %v496_v12 }
  0x8d   : > { %600 = vmatpush.msra.mxu0 %v501_v14  ;;  %v2391_v14 = vld [vmem:[%s3090_s4 + $0x50] sm:$0xff] }
  0x8e   : > { %2074 = vmatmul.msk.f32.vlgmr.msra.gmra.mxu0 %vm558_vm1, %v502_v13  ;;  %v642_v13 = vld [vmem:[%s3091_s5 + $0x40] sm:$0xff] }
  0x91   : > { %v536_v31 = vpop.permute.xlu1 %535 }
  0x93   : > { %v531_v28 = vpop.permute.xlu0 %530 }
  0x96   : > { %2075 = vmatmul.msk.f32.gmra.mxu0 %vm558_vm1, %v503_v16  ;;  %v641_v16 = vld [vmem:[%s3091_s5 + $0x38] sm:$0xff] }
  0x99   : > { %v526_v55 = vpop.permute.xlu1 %525 }
  0x9e   : > { %2076 = vmatmul.msk.f32.gmra.mxu0 %vm558_vm1, %v504_v17  ;;  %v649_v17 = vld [vmem:[%s3091_s5 + $0x78] sm:$0xff] }
  0xa6   : > { %2077 = vmatmul.msk.f32.gmra.mxu0 %vm558_vm1, %v505_v18  ;;  %v645_v18 = vld [vmem:[%s3091_s5 + $0x58] sm:$0xff] }
  0xae   : > { %2078 = vmatmul.msk.f32.gmra.mxu0 %vm558_vm1, %v506_v19  ;;  %v636_v19 = vld [vmem:[%s3091_s5 + $0x10] sm:$0xff] }
  0xb6   : > { %2079 = vmatmul.msk.f32.gmra.mxu0 %vm558_vm1, %v507_v20  ;;  %v2392_v20 = vld [vmem:[%s3090_s4 + $0x58] sm:$0xff] }
  0xbe   : > { %2080 = vmatmul.msk.f32.gmra.mxu0 %vm558_vm1, %v508_v21  ;;  %v644_v21 = vld [vmem:[%s3091_s5 + $0x50] sm:$0xff] }
  0xc6   : > { %2081 = vmatmul.msk.f32.gmra.mxu0 %vm558_vm1, %v509_v22  ;;  %v640_v22 = vld [vmem:[%s3091_s5 + $0x30] sm:$0xff] }
 0x10b   : > { %v602_v23 = vpop.f32.mrf.mxu0 }
 0x10c   : > { %v603_v62 = vadd.f32 %v602_v23, %v521_v57  ;;  %v635_v23 = vld [vmem:[%s3091_s5 + $0x8] sm:$0xff]  ;;  %v2401_v57 = vld [vmem:[%s3090_s4 + $0x20] sm:$0xff] }
 0x10e   : > { %v626_v3 = vmax.f32 %v603_v62, 0.0 }
 0x110   : > { %v650_v9 = vpack.c.bf16 %v626_v3, %v626_v3 }
 0x112   : > { %v699_v11 = vunpack.c.l.b16 %v650_v9 }
 0x113   : > { %v605_v25 = vpop.f32.mrf.mxu0 }
 0x114   : > { %v606_v60 = vadd.f32 %v605_v25, %v526_v55  ;;  %v639_v25 = vld [vmem:[%s3091_s5 + $0x28] sm:$0xff]  ;;  %v2400_v55 = vld [vmem:[%s3090_s4 + $0x18] sm:$0xff] }
 0x116   : > { %v627_v1 = vmax.f32 %v606_v60, 0.0  ;;  %v2409_v60 = vld [vmem:[%s3090_s4 + $0xa0] sm:$0xff] }
 0x118   : > { %v651_v6 = vpack.c.bf16 %v627_v1, %v627_v1 }
 0x11a   : > { %v700_v10 = vunpack.c.l.b16 %v651_v6 }
 0x11b   : > { %v608_v27 = vpop.f32.mrf.mxu0 }
 0x11c   : > { %v609_v29 = vadd.f32 %v608_v27, %v531_v28  ;;  %v707_v12 = vpack.c.b16 %v700_v10, %v699_v11  ;;  %v638_v27 = vld [vmem:[%s3091_s5 + $0x20] sm:$0xff] }
 0x11d   : > { %v634_v28 = vld [vmem:[%s3091_s5] sm:$0xff] }
 0x11e   : > { %v628_v30 = vmax.f32 %v609_v29, 0.0  ;;  %v637_v29 = vld [vmem:[%s3091_s5 + $0x18] sm:$0xff] }
 0x120   : > { %v652_v34 = vpack.c.bf16 %v628_v30, %v628_v30  ;;  %v2394_v30 = vld [vmem:[%s3090_s4 + $0x68] sm:$0xff] }
 0x122   : > { %v701_v38 = vunpack.c.l.b16 %v652_v34  ;;  %v2396_v34 = vld [vmem:[%s3090_s4 + $0x78] sm:$0xff] }
 0x123   : > { %v611_v32 = vpop.f32.mrf.mxu0 }
 0x124   : > { %v612_v33 = vadd.f32 %v611_v32, %v536_v31  ;;  %v2395_v31 = vld [vmem:[%s3090_s4 + $0x70] sm:$0xff] }
 0x125   : > { %v2431_v32 = vld [vmem:[%s3092_s6 + $0x90] sm:$0xff] }
 0x126   : > { %v629_v35 = vmax.f32 %v612_v33, 0.0 }
 0x128   : > { %v653_v36 = vpack.c.bf16 %v629_v35, %v629_v35 }
 0x12a   : > { %v702_v39 = vunpack.c.l.b16 %v653_v36 }
 0x12b   : > { %v614_v40 = vpop.f32.mrf.mxu0 }
 0x12c   : > { %v708_v41 = vpack.c.b16 %v702_v39, %v701_v38  ;;  %v615_v42 = vadd.f32 %v614_v40, %v541_v37  ;;  %v2403_v38 = vld [vmem:[%s3090_s4 + $0x30] sm:$0xff]  ;;  %v2397_v39 = vld [vmem:[%s3090_s4] sm:$0xff] }
 0x12d   : > { %v2389_v40 = vld [vmem:[%s3090_s4 + $0x40] sm:$0xff] }
 0x12e   : > { %713 = vrot.lane.b32.xlu1 %v708_v41, %s2476_s28  ;;  %v630_v43 = vmax.f32 %v615_v42, 0.0 }
 0x130   : > { %v654_v47 = vpack.c.bf16 %v630_v43, %v630_v43 }
 0x132   : > { %v703_v50 = vunpack.c.l.b16 %v654_v47  ;;  %v2398_v47 = vld [vmem:[%s3090_s4 + $0x8] sm:$0xff] }
 0x133   : > { %v617_v45 = vpop.f32.mrf.mxu0 }
 0x134   : > { %v618_v46 = vadd.f32 %v617_v45, %v546_v44 }
 0x136   : > { %v631_v48 = vmax.f32 %v618_v46, 0.0  ;;  %v2404_v46 = vld [vmem:[%s3090_s4 + $0x38] sm:$0xff] }
 0x138   : > { %v655_v49 = vpack.c.bf16 %v631_v48, %v631_v48 }
 0x13a   : > { %v704_v51 = vunpack.c.l.b16 %v655_v49 }
 0x13b   : > { %v620_v52 = vpop.f32.mrf.mxu0 }
 0x13c   : > { %v709_v53 = vpack.c.b16 %v704_v51, %v703_v50  ;;  %v621_v54 = vadd.f32 %v620_v52, %v551_v24  ;;  %v643_v24 = vld [vmem:[%s3091_s5 + $0x48] sm:$0xff]  ;;  %v2405_v52 = vld [vmem:[%s3090_s4 + $0x80] sm:$0xff] }
 0x13d   : > { %v2390_v51 = vld [vmem:[%s3090_s4 + $0x48] sm:$0xff] }
 0x13e   : > { %715 = vrot.lane.b32.xlu0 %v709_v53, %s2476_s28  ;;  %985 = vrot.lane.b32.xlu1 %v709_v53, %s2474_s21  ;;  %v632_v56 = vmax.f32 %v621_v54, 0.0  ;;  %v2406_v54 = vld [vmem:[%s3090_s4 + $0x88] sm:$0xff] }
 0x140   : > { %v656_v63 = vpack.c.bf16 %v632_v56, %v632_v56  ;;  %v2407_v56 = vld [vmem:[%s3090_s4 + $0x90] sm:$0xff] }
 0x142   : > { %v705_v4 = vunpack.c.l.b16 %v656_v63  ;;  %v2411_v63 = vld [vmem:[%s3090_s4 + $0xb0] sm:$0xff] }
 0x143   : > { %v623_v58 = vpop.f32.mrf.mxu0 }
 0x144   : > { %v624_v61 = vadd.f32 %v623_v58, %v556_v26  ;;  %v2393_v26 = vld [vmem:[%s3090_s4 + $0x60] sm:$0xff]  ;;  %v2408_v58 = vld [vmem:[%s3090_s4 + $0x98] sm:$0xff] }
 0x146   : > { %v633_v0 = vmax.f32 %v624_v61, 0.0  ;;  %1203 = vperm.xlu1 %2457, %v648_v59   ;;  %v2402_v59 = vld [vmem:[%s3090_s4 + $0x28] sm:$0xff] }
 0x147   : > { %v2410_v61 = vld [vmem:[%s3090_s4 + $0xa8] sm:$0xff] }
 0x148   : > { %v657_v2 = vpack.c.bf16 %v633_v0, %v633_v0 }
 0x14a   : > { %v706_v5 = vunpack.c.l.b16 %v657_v2 }
 0x14c   : > { %v710_v7 = vpack.c.b16 %v706_v5, %v705_v4  ;;  %v2412_v5 = vld [vmem:[%s3090_s4 + $0xb8] sm:$0xff] }
 0x14e   : > { %717 = vrot.lane.b32.xlu2 %v710_v7, %s2476_s28  ;;  %919 = vmatpush.bf16.msrb.mxu0 %v710_v7 }
 0x14f   : > { %2441 = vmatpush.bf16.msra.mxu2 %v710_v7  ;;  %987 = vrot.lane.b32.xlu0 %v710_v7, %s2474_s21 }
 0x150   : > { %1198 = vperm.xlu1 %2457, %v647_v8  }
 0x152   : > { %920 = vmatpush.bf16.msrb.mxu0 %v709_v53 }
 0x153   : > { %2442 = vmatpush.bf16.msra.mxu2 %v709_v53  ;;  %v2399_v53 = vld [vmem:[%s3090_s4 + $0x10] sm:$0xff] }
 0x156   : > { %711 = vrot.lane.b32.xlu2 %v707_v12, %s2476_s28  ;;  %921 = vmatpush.bf16.msrb.mxu0 %v708_v41 }
 0x157   : > { %981 = vrot.lane.b32.xlu0 %v707_v12, %s2474_s21  ;;  %2443 = vmatpush.bf16.msra.mxu2 %v708_v41 }
 0x158   : > { %1173 = vperm.xlu1 %2457, %v642_v13  }
 0x15a   : > { %922 = vmatpush.bf16.msrb.mxu0 %v707_v12 }
 0x15b   : > { %2444 = vmatpush.bf16.msra.mxu2 %v707_v12 }
 0x15d   : > { %2178 = vmatmul.msk.bf16.vlgmr.msrb.gmra.mxu0 %vm773_vm2, %v2389_v40 }
 0x15e   : > { %983 = vrot.lane.b32.xlu2 %v708_v41, %s2474_s21  ;;  %2180 = vmatmul.msk.bf16.vlgmr.msra.gmra.mxu2 %vm773_vm2, %v2391_v14 }
 0x15f   : > { %1193 = vperm.xlu0 %2459, %v646_v15  }
 0x160   : > { %1168 = vperm.xlu1 %2457, %v641_v16  }
 0x166   : > { %1208 = vperm.xlu2 %2458, %v649_v17  }
 0x167   : > { %1188 = vperm.xlu0 %2459, %v645_v18  }
 0x168   : > { %1143 = vperm.xlu1 %2457, %v636_v19  }
 0x16d   : > { %2179 = vmatmul.msk.bf16.gmra.mxu0 %vm773_vm2, %v2390_v51 }
 0x16e   : > { %1183 = vperm.xlu2 %2458, %v644_v21   ;;  %2181 = vmatmul.msk.bf16.gmra.mxu2 %vm773_vm2, %v2392_v20 }
 0x16f   : > { %1163 = vperm.xlu0 %2459, %v640_v22  }
 0x170   : > { %1138 = vperm.xlu1 %2457, %v635_v23  }
 0x176   : > { %1178 = vperm.xlu2 %2458, %v643_v24  }
 0x177   : > { %1158 = vperm.xlu0 %2459, %v639_v25  }
 0x17e   : > { %1153 = vperm.xlu2 %2458, %v638_v27   ;;  %2182 = vmatmul.msk.bf16.gmra.mxu2 %vm773_vm2, %v2393_v26 }
 0x17f   : > { %1133 = vperm.xlu0 %2459, %v634_v28  }
 0x186   : > { %1148 = vperm.xlu2 %2458, %v637_v29  }
 0x18e   : > { %2183 = vmatmul.msk.bf16.gmra.mxu2 %vm773_vm2, %v2394_v30 }
 0x19e   : > { %2184 = vmatmul.msk.bf16.gmra.mxu2 %vm773_vm2, %v2395_v31 }
 0x1a0   : > { %v714_v36 = vpop.permute.xlu1 %713 }
 0x1a8   : > { %v718_v33 = vpop.permute.xlu2 %717 }
 0x1a9   : > { %2131 = vmatpush.bf16.msk.msra.mxu1 %vm2705_vm4, %v718_v33  ;;  %2437 = vmatpush.bf16.msk.msra.mxu3 %vm2705_vm4, %v718_v33 }
 0x1ae   : > { %2185 = vmatmul.msk.bf16.gmra.mxu2 %vm773_vm2, %v2396_v34 }
 0x1b0   : > { %v716_v35 = vpop.permute.xlu0 %715  ;;  %v712_v37 = vpop.permute.xlu2 %711 }
 0x1b1   : > { %2133 = vmatpush.bf16.msk.msra.mxu1 %vm2705_vm4, %v716_v35  ;;  %2438 = vmatpush.bf16.msk.msra.mxu3 %vm2705_vm4, %v716_v35  ;;  %v986_v43 = vpop.permute.xlu1 %985 }
 0x1b2   : > { %v997_v44 = vsel %vm989_vm5, %v986_v43, 0 }
 0x1b5   : > { %2135 = vmatpush.bf16.msk.msra.mxu1 %vm2705_vm4, %v714_v36  ;;  %2439 = vmatpush.bf16.msk.msra.mxu3 %vm2705_vm4, %v714_v36 }
 0x1b8   : > { %v984_v45 = vpop.permute.xlu2 %983 }
 0x1b9   : > { %2137 = vmatpush.bf16.msk.msra.mxu1 %vm2705_vm4, %v712_v37  ;;  %2440 = vmatpush.bf16.msk.msra.mxu3 %vm2705_vm4, %v712_v37  ;;  %v994_v48 = vsel %vm989_vm5, %v984_v45, 0  ;;  %v2797_v62 = vpop.permute.xlu1 %1203 }
 0x1bc   : > { %2144 = vmatmul.msk.bf16.vlgmr.msra.gmra.mxu3 %vm773_vm2, %v2403_v38  ;;  %2138 = vmatmul.msk.bf16.vlgmr.msra.gmra.mxu1 %vm773_vm2, %v2397_v39 }
 0x1c0   : > { %v2823_v10 = vpop.permute.xlu2 %1208 }
 0x1c1   : > { %v988_v41 = vpop.permute.xlu0 %987 }
 0x1c2   : > { %v1000_v42 = vsel %vm989_vm5, %v988_v41, 0  ;;  %v2807_v2 = vpop.permute.xlu1 %1198 }
 0x1c3   : > { %1070 = vmatpush.bf16.msrb.mxu3 %v1000_v42 }
 0x1c7   : > { %1071 = vmatpush.bf16.msrb.mxu3 %v997_v44 }
 0x1c8   : > { %v2829_v16 = vpop.permute.xlu2 %1183 }
 0x1c9   : > { %v982_v49 = vpop.permute.xlu0 %981 }
 0x1ca   : > { %v991_v50 = vsel %vm989_vm5, %v982_v49, 0  ;;  %v2816_v7 = vpop.permute.xlu1 %1173 }
 0x1cb   : > { %1072 = vmatpush.bf16.msrb.mxu3 %v994_v48 }
 0x1cc   : > { %2145 = vmatmul.msk.bf16.gmra.mxu3 %vm773_vm2, %v2404_v46  ;;  %2139 = vmatmul.msk.bf16.gmra.mxu1 %vm773_vm2, %v2398_v47 }
 0x1cf   : > { %1073 = vmatpush.bf16.msrb.mxu3 %v991_v50 }
 0x1d0   : > { %v2831_v24 = vpop.permute.xlu2 %1178 }
 0x1d1   : > { %v2802_v0 = vpop.permute.xlu0 %1193 }
 0x1d2   : > { %v2825_v13 = vpop.permute.xlu1 %1168 }
 0x1d8   : > { %v1154_v39 = vpop.permute.xlu2 %1153 }
 0x1d9   : > { %v2809_v3 = vpop.permute.xlu0 %1188 }
 0x1da   : > { %v924_v11 = vpop.f32.mrf.mxu0  ;;  %v1144_v20 = vpop.permute.xlu1 %1143 }
 0x1dc   : > { %2234 = vmatmul.msk.bf16.vlgmr.msrb.gmra.mxu3 %vm773_vm2, %v2405_v52  ;;  %2140 = vmatmul.msk.bf16.gmra.mxu1 %vm773_vm2, %v2399_v53 }
 0x1e1   : > { %v2819_v8 = vpop.permute.xlu0 %1163  ;;  %v934_v27 = vpop.f32.mrf.mxu2 }
 0x1e2   : > { %v926_v18 = vpop.f32.mrf.mxu0  ;;  %v1139_v34 = vpop.permute.xlu1 %1138 }
 0x1e9   : > { %v1159_v15 = vpop.permute.xlu0 %1158  ;;  %v936_v41 = vpop.f32.mrf.mxu2 }
 0x1ea   : > { %v929_v28 = vpop.f32.mrf.mxu0 }
 0x1ec   : > { %2235 = vmatmul.msk.bf16.gmra.mxu3 %vm773_vm2, %v2406_v54  ;;  %2141 = vmatmul.msk.bf16.gmra.mxu1 %vm773_vm2, %v2400_v55  ;;  %v1149_v54 = vpop.permute.xlu2 %1148 }
 0x1f1   : > { %v1134_v23 = vpop.permute.xlu0 %1133  ;;  %v939_v55 = vpop.f32.mrf.mxu2 }
 0x1f2   : > { %v931_v47 = vpop.f32.mrf.mxu0 }
 0x1fc   : > { %2236 = vmatmul.msk.bf16.gmra.mxu3 %vm773_vm2, %v2407_v56  ;;  %2142 = vmatmul.msk.bf16.gmra.mxu1 %vm773_vm2, %v2401_v57 }
 0x20c   : > { %2237 = vmatmul.msk.bf16.gmra.mxu3 %vm773_vm2, %v2408_v58  ;;  %2143 = vmatmul.msk.bf16.gmra.mxu1 %vm773_vm2, %v2402_v59 }
 0x21c   : > { %2238 = vmatmul.msk.bf16.gmra.mxu3 %vm773_vm2, %v2409_v60 }
 0x22c   : > { %2239 = vmatmul.msk.bf16.gmra.mxu3 %vm773_vm2, %v2410_v61 }
 0x239   : > { %v807_v6 = vpop.f32.mrf.mxu1 }
 0x23a   : > { %v925_v17 = vadd.f32 %v924_v11, %v807_v6 }
 0x23c   : > { %2240 = vmatmul.msk.bf16.gmra.mxu3 %vm773_vm2, %v2411_v63 }
 0x23f   : > { %v2805_v1 = vpop.f32.mrf.mxu3 }
 0x241   : > { %v809_v12 = vpop.f32.mrf.mxu1 }
 0x242   : > { %v927_v26 = vadd.f32 %v926_v18, %v809_v12 }
 0x247   : > { %v2811_v4 = vpop.f32.mrf.mxu3 }
 0x249   : > { %v812_v19 = vpop.f32.mrf.mxu1 }
 0x24a   : > { %v930_v38 = vadd.f32 %v929_v28, %v812_v19 }
 0x24c   : > { %2241 = vmatmul.msk.bf16.gmra.mxu3 %vm773_vm2, %v2412_v5 }
 0x24f   : > { %v2821_v9 = vpop.f32.mrf.mxu3 }
 0x251   : > { %v814_v30 = vpop.f32.mrf.mxu1 }
 0x252   : > { %v932_v50 = vadd.f32 %v931_v47, %v814_v30 }
 0x257   : > { %v2827_v14 = vpop.f32.mrf.mxu3 }
 0x259   : > { %v817_v46 = vpop.f32.mrf.mxu1 }
 0x25a   : > { %v935_v59 = vadd.f32 %v934_v27, %v817_v46 }
 0x25f   : > { %v1075_v21 = vpop.f32.mrf.mxu3 }
 0x260   : > { %v1115_v22 = vadd.f32 %v1075_v21, %v925_v17  ;;  %v941_v17 = vpop.f32.mrf.mxu2 }
 0x261   : > { %v819_v57 = vpop.f32.mrf.mxu1 }
 0x262   : > { %v1211_v25 = vadd.f32 %v1134_v23, %v1115_v22 }
 0x264   : > { %v1227_v31 = vmax.f32 %v1211_v25, 0.0 }
 0x266   : > { %v1259_v36 = vpack.c.bf16 %v1227_v31, %v1227_v31 }
 0x267   : > { %v1077_v29 = vpop.f32.mrf.mxu3 }
 0x268   : > { %v1116_v33 = vadd.f32 %v1077_v29, %v927_v26  ;;  %v1324_v43 = vunpack.c.l.b16 %v1259_v36  ;;  %v944_v27 = vpop.f32.mrf.mxu2 }
 0x269   : > { %v822_v19 = vpop.f32.mrf.mxu1 }
 0x26a   : > { %v1212_v35 = vadd.f32 %v1139_v34, %v1116_v33  ;;  %v940_v28 = vadd.f32 %v939_v55, %v822_v19 }
 0x26c   : > { %v1228_v37 = vmax.f32 %v1212_v35, 0.0 }
 0x26e   : > { %v1260_v40 = vpack.c.bf16 %v1228_v37, %v1228_v37 }
 0x26f   : > { %v1080_v42 = vpop.f32.mrf.mxu3 }
 0x270   : > { %v1325_v44 = vunpack.c.l.b16 %v1260_v40  ;;  %v1117_v45 = vadd.f32 %v1080_v42, %v930_v38  ;;  %v946_v40 = vpop.f32.mrf.mxu2 }
 0x271   : > { %v824_v31 = vpop.f32.mrf.mxu1 }
 0x272   : > { %v2833_v48 = vpack.c.b16 %v1325_v44, %v1324_v43  ;;  %v1213_v49 = vadd.f32 %v1144_v20, %v1117_v45  ;;  %v937_v20 = vadd.f32 %v936_v41, %v819_v57 }
 0x274   : > { %v1229_v52 = vmax.f32 %v1213_v49, 0.0 }
 0x276   : > { %v1261_v58 = vpack.c.bf16 %v1229_v52, %v1229_v52 }
 0x277   : > { %v1082_v51 = vpop.f32.mrf.mxu3 }
 0x278   : > { %v1118_v53 = vadd.f32 %v1082_v51, %v932_v50  ;;  %v1326_v5 = vunpack.c.l.b16 %v1261_v58 }
 0x27a   : > { %v1214_v56 = vadd.f32 %v1149_v54, %v1118_v53  ;;  %v949_v54 = vpop.f32.mrf.mxu2 }
 0x27c   : > { %v1230_v60 = vmax.f32 %v1214_v56, 0.0 }
 0x27e   : > { %v1262_v61 = vpack.c.bf16 %v1230_v60, %v1230_v60 }
 0x27f   : > { %v1085_v63 = vpop.f32.mrf.mxu3 }
 0x280   : > { %v1327_v6 = vunpack.c.l.b16 %v1262_v61  ;;  %v1119_v11 = vadd.f32 %v1085_v63, %v935_v59 }
 0x282   : > { %v2835_v12 = vpack.c.b16 %v1327_v6, %v1326_v5  ;;  %v1215_v18 = vadd.f32 %v1154_v39, %v1119_v11  ;;  %v942_v39 = vadd.f32 %v941_v17, %v824_v31  ;;  %v951_v61 = vpop.f32.mrf.mxu2 }
 0x284   : > { %v1231_v22 = vmax.f32 %v1215_v18, 0.0 }
 0x286   : > { %v1263_v26 = vpack.c.bf16 %v1231_v22, %v1231_v22 }
 0x287   : > { %v1087_v21 = vpop.f32.mrf.mxu3 }
 0x288   : > { %v1120_v23 = vadd.f32 %v1087_v21, %v937_v20  ;;  %v1328_v34 = vunpack.c.l.b16 %v1263_v26 }
 0x28a   : > { %v1216_v25 = vadd.f32 %v1159_v15, %v1120_v23  ;;  %v827_v15 = vpop.f32.mrf.mxu1  ;;  %v954_v20 = vpop.f32.mrf.mxu2 }
 0x28b   : > { %v945_v46 = vadd.f32 %v944_v27, %v827_v15 }
 0x28c   : > { %v1232_v29 = vmax.f32 %v1216_v25, 0.0 }
 0x28e   : > { %v1264_v30 = vpack.c.bf16 %v1232_v29, %v1232_v29 }
 0x28f   : > { %v1090_v33 = vpop.f32.mrf.mxu3 }
 0x290   : > { %v1329_v35 = vunpack.c.l.b16 %v1264_v30  ;;  %v1121_v36 = vadd.f32 %v1090_v33, %v940_v28 }
 0x292   : > { %v2837_v37 = vpack.c.b16 %v1329_v35, %v1328_v34  ;;  %v1217_v38 = vadd.f32 %v2819_v8, %v1121_v36  ;;  %v829_v8 = vpop.f32.mrf.mxu1  ;;  %v956_v22 = vpop.f32.mrf.mxu2 }
 0x293   : > { %v947_v57 = vadd.f32 %v946_v40, %v829_v8 }
 0x294   : > { %v1233_v42 = vmax.f32 %v1217_v38, 0.0 }
 0x296   : > { %v1265_v45 = vpack.c.bf16 %v1233_v42, %v1233_v42 }
 0x297   : > { %v1092_v41 = vpop.f32.mrf.mxu3 }
 0x298   : > { %v1122_v43 = vadd.f32 %v1092_v41, %v942_v39  ;;  %v1330_v51 = vunpack.c.l.b16 %v1265_v45 }
 0x29a   : > { %v1218_v44 = vadd.f32 %v2825_v13, %v1122_v43  ;;  %v832_v28 = vpop.f32.mrf.mxu1  ;;  %v959_v31 = vpop.f32.mrf.mxu2 }
 0x29b   : > { %v960_v36 = vadd.f32 %v959_v31, %v2821_v9  ;;  %v950_v15 = vadd.f32 %v949_v54, %v832_v28 }
 0x29c   : > { %v1234_v47 = vmax.f32 %v1218_v44, 0.0 }
 0x29e   : > { %v1266_v49 = vpack.c.bf16 %v1234_v47, %v1234_v47 }
 0x29f   : > { %v1095_v50 = vpop.f32.mrf.mxu3 }
 0x2a0   : > { %v1331_v52 = vunpack.c.l.b16 %v1266_v49  ;;  %v1123_v53 = vadd.f32 %v1095_v50, %v945_v46 }
 0x2a2   : > { %v2841_v55 = vpack.c.b16 %v1331_v52, %v1330_v51  ;;  %v1219_v56 = vadd.f32 %v2816_v7, %v1123_v53  ;;  %v955_v7 = vadd.f32 %v954_v20, %v2805_v1  ;;  %v834_v42 = vpop.f32.mrf.mxu1  ;;  %v961_v43 = vpop.f32.mrf.mxu2  ;;  %v1243_v20 = vld [vmem:[%s3093_s7] sm:$0xff] }
 0x2a3   : > { %v952_v44 = vadd.f32 %v951_v61, %v834_v42  ;;  %v1255_v61 = vld [vmem:[%s3093_s7 + $0x60] sm:$0xff]  ;;  %v2414_v42 = vld [vmem:[%s3092_s6 + $0x48] sm:$0xff] }
 0x2a4   : > { %v1235_v59 = vmax.f32 %v1219_v56, 0.0 }
 0x2a6   : > { %v1267_v63 = vpack.c.bf16 %v1235_v59, %v1235_v59 }
 0x2a7   : > { %v1097_v58 = vpop.f32.mrf.mxu3 }
 0x2a8   : > { %v1124_v60 = vadd.f32 %v1097_v58, %v947_v57  ;;  %v1332_v17 = vunpack.c.l.b16 %v1267_v63  ;;  %v1252_v63 = vld [vmem:[%s3093_s7 + $0x48] sm:$0xff] }
 0x2aa   : > { %v1220_v13 = vadd.f32 %v2831_v24, %v1124_v60  ;;  %v957_v24 = vadd.f32 %v956_v22, %v2811_v4  ;;  %v1955_v22 = vld [vmem:[%s3098_s12] sm:$0x7] }
 0x2ac   : > { %v1236_v5 = vmax.f32 %v1220_v13, 0.0  ;;  %v1258_v13 = vld [vmem:[%s3093_s7 + $0x78] sm:$0xff] }
 0x2ae   : > { %v1268_v6 = vpack.c.bf16 %v1236_v5, %v1236_v5  ;;  %v1251_v5 = vld [vmem:[%s3093_s7 + $0x40] sm:$0xff] }
 0x2af   : > { %v1100_v11 = vpop.f32.mrf.mxu3 }
 0x2b0   : > { %v1333_v18 = vunpack.c.l.b16 %v1268_v6  ;;  %v1125_v47 = vadd.f32 %v1100_v11, %v950_v15  ;;  %v1249_v6 = vld [vmem:[%s3093_s7 + $0x30] sm:$0xff] }
 0x2b1   : > { %v1253_v11 = vld [vmem:[%s3093_s7 + $0x50] sm:$0xff] }
 0x2b2   : > { %v1344_v19 = vpack.c.b16 %v1333_v18, %v1332_v17  ;;  %v1221_v52 = vadd.f32 %v2829_v16, %v1125_v47  ;;  %v1246_v17 = vld [vmem:[%s3093_s7 + $0x18] sm:$0xff]  ;;  %v1245_v18 = vld [vmem:[%s3093_s7 + $0x10] sm:$0xff] }
 0x2b3   : > { %v2415_v47 = vld [vmem:[%s3092_s6 + $0x50] sm:$0xff] }
 0x2b4   : > { %1615 = vrot.lane.b32.xlu1 %v1344_v19, %s2474_s21  ;;  %v1237_v56 = vmax.f32 %v1221_v52, 0.0  ;;  %v2416_v52 = vld [vmem:[%s3092_s6 + $0x58] sm:$0xff] }
 0x2b6   : > { %v1269_v60 = vpack.c.bf16 %v1237_v56, %v1237_v56  ;;  %v2418_v56 = vld [vmem:[%s3092_s6 + $0x68] sm:$0xff] }
 0x2b7   : > { %v1102_v21 = vpop.f32.mrf.mxu3 }
 0x2b8   : > { %v1126_v45 = vadd.f32 %v1102_v21, %v952_v44  ;;  %v2460_v21 = vld [vmem:[#allocation2] ss:$0 sm:$0xff] }
 0x2ba   : > { %v1222_v50 = vadd.f32 %v2809_v3, %v1126_v45 }
 0x2bc   : > { %v1238_v54 = vmax.f32 %v1222_v50, 0.0  ;;  %v2421_v50 = vld [vmem:[%s3092_s6] sm:$0xff] }
 0x2be   : > { %v1270_v58 = vpack.c.bf16 %v1238_v54, %v1238_v54  ;;  %v2423_v54 = vld [vmem:[%s3092_s6 + $0x10] sm:$0xff] }
 0x2bf   : > { %v1105_v23 = vpop.f32.mrf.mxu3 }
 0x2c0   : > { %v1127_v25 = vadd.f32 %v1105_v23, %v955_v7  ;;  %v1335_v3 = vunpack.c.l.b16 %v1270_v58  ;;  %v1247_v7 = vld [vmem:[%s3093_s7 + $0x20] sm:$0xff]  ;;  %v1244_v23 = vld [vmem:[%s3093_s7 + $0x8] sm:$0xff]  ;;  %v2419_v58 = vld [vmem:[%s3092_s6 + $0x70] sm:$0xff] }
 0x2c2   : > { %v1223_v26 = vadd.f32 %v2802_v0, %v1127_v25  ;;  %v1905_v25 = vld [vmem:[%s3097_s11] sm:$0x7] }
 0x2c4   : > { %v1239_v27 = vmax.f32 %v1223_v26, 0.0 }
 0x2c6   : > { %v1271_v34 = vpack.c.bf16 %v1239_v27, %v1239_v27 }
 0x2c7   : > { %v1107_v29 = vpop.f32.mrf.mxu3 }
 0x2c8   : > { %v1128_v30 = vadd.f32 %v1107_v29, %v957_v24  ;;  %v1336_v39 = vunpack.c.l.b16 %v1271_v34 }
 0x2ca   : > { %v1224_v33 = vadd.f32 %v2807_v2, %v1128_v30  ;;  %v962_v2 = vadd.f32 %v961_v43, %v2827_v14 }
 0x2cc   : > { %v1240_v35 = vmax.f32 %v1224_v33, 0.0  ;;  %v2413_v33 = vld [vmem:[%s3092_s6 + $0x40] sm:$0xff] }
 0x2ce   : > { %v1272_v38 = vpack.c.bf16 %v1240_v35, %v1240_v35 }
 0x2cf   : > { %v1110_v1 = vpop.f32.mrf.mxu3 }
 0x2d0   : > { %v1337_v40 = vunpack.c.l.b16 %v1272_v38  ;;  %v1129_v41 = vadd.f32 %v1110_v1, %v960_v36 }
 0x2d2   : > { %v1225_v0 = vadd.f32 %v2797_v62, %v1129_v41  ;;  %v1346_v4 = vpack.c.b16 %v1337_v40, %v1336_v39 }
 0x2d4   : > { %1619 = vrot.lane.b32.xlu0 %v1346_v4, %s2474_s21  ;;  %v1241_v9 = vmax.f32 %v1225_v0, 0.0 }
 0x2d6   : > { %v1273_v62 = vpack.c.bf16 %v1241_v9, %v1241_v9 }
 0x2d7   : > { %v1112_v46 = vpop.f32.mrf.mxu3 }
 0x2d8   : > { %v1130_v49 = vadd.f32 %v1112_v46, %v962_v2  ;;  %v1338_v57 = vunpack.c.l.b16 %v1273_v62  ;;  %v2429_v46 = vld [vmem:[%s3092_s6 + $0x80] sm:$0xff]  ;;  %v2422_v62 = vld [vmem:[%s3092_s6 + $0x8] sm:$0xff] }
 0x2da   : > { %v1226_v51 = vadd.f32 %v2823_v10, %v1130_v49  ;;  %v1334_v10 = vunpack.c.l.b16 %v1269_v60  ;;  %v2434_v60 = vld [vmem:[%s3092_s6 + $0xa8] sm:$0xff] }
 0x2dc   : > { %v1242_v53 = vmax.f32 %v1226_v51, 0.0  ;;  %1360 = vrot.lane.b32.xlu0 %v1346_v4, %s2476_s28  ;;  %v1345_v16 = vpack.c.b16 %v1335_v3, %v1334_v10  ;;  %v2430_v51 = vld [vmem:[%s3092_s6 + $0x88] sm:$0xff]  ;;  %v2420_v3 = vld [vmem:[%s3092_s6 + $0x78] sm:$0xff] }
 0x2dd   : > { %v2426_v10 = vld [vmem:[%s3092_s6 + $0x28] sm:$0xff] }
 0x2de   : > { %v1274_v8 = vpack.c.bf16 %v1242_v53, %v1242_v53  ;;  %v2417_v53 = vld [vmem:[%s3092_s6 + $0x60] sm:$0xff] }
 0x2e0   : > { %v1339_v14 = vunpack.c.l.b16 %v1274_v8  ;;  %v2432_v8 = vld [vmem:[%s3092_s6 + $0x98] sm:$0xff] }
 0x2e2   : > { %v1347_v59 = vpack.c.b16 %v1339_v14, %v1338_v57  ;;  %v2424_v57 = vld [vmem:[%s3092_s6 + $0x18] sm:$0xff]  ;;  %v2433_v14 = vld [vmem:[%s3092_s6 + $0xa0] sm:$0xff] }
 0x2e4   : > { %1362 = vrot.lane.b32.xlu1 %v1347_v59, %s2476_s28  ;;  %1621 = vrot.lane.b32.xlu2 %v1347_v59, %s2474_s21 }
 0x2e5   : > { %1541 = vmatpush.bf16.msrb.mxu1 %v1347_v59  ;;  %1613 = vrot.lane.b32.xlu0 %v2841_v55, %s2474_s21  ;;  %v2425_v59 = vld [vmem:[%s3092_s6 + $0x20] sm:$0xff] }
 0x2e9   : > { %1542 = vmatpush.bf16.msrb.mxu1 %v1346_v4 }
 0x2ec   : > { %1356 = vrot.lane.b32.xlu1 %v1344_v19, %s2476_s28  ;;  %1617 = vrot.lane.b32.xlu2 %v1345_v16, %s2474_s21 }
 0x2ed   : > { %1543 = vmatpush.bf16.msrb.mxu1 %v1345_v16  ;;  %1354 = vrot.lane.b32.xlu0 %v2841_v55, %s2476_s28 }
 0x2f1   : > { %1544 = vmatpush.bf16.msrb.mxu1 %v1344_v19  ;;  %v1250_v19 = vld [vmem:[%s3093_s7 + $0x38] sm:$0xff] }
 0x2f4   : > { %1609 = vrot.lane.b32.xlu1 %v2835_v12, %s2474_s21  ;;  %1358 = vrot.lane.b32.xlu2 %v1345_v16, %s2476_s28  ;;  %v2435_v16 = vld [vmem:[%s3092_s6 + $0xb0] sm:$0xff] }
 0x2f5   : > { %1545 = vmatpush.bf16.msrb.mxu1 %v2841_v55  ;;  %1607 = vrot.lane.b32.xlu0 %v2833_v48, %s2474_s21  ;;  %v1257_v55 = vld [vmem:[%s3093_s7 + $0x70] sm:$0xff] }
 0x2f9   : > { %1546 = vmatpush.bf16.msrb.mxu1 %v2837_v37 }
 0x2fc   : > { %1350 = vrot.lane.b32.xlu1 %v2835_v12, %s2476_s28  ;;  %1611 = vrot.lane.b32.xlu2 %v2837_v37, %s2474_s21 }
 0x2fd   : > { %1547 = vmatpush.bf16.msrb.mxu1 %v2835_v12  ;;  %1837 = vperm.xlu0 %2459, %v1258_v13   ;;  %v1254_v12 = vld [vmem:[%s3093_s7 + $0x58] sm:$0xff]  ;;  %v2427_v13 = vld [vmem:[%s3092_s6 + $0x30] sm:$0xff] }
 0x301   : > { %1548 = vmatpush.bf16.msrb.mxu1 %v2833_v48 }
 0x304   : > { %1832 = vperm.xlu1 %2457, %v1257_v55   ;;  %1352 = vrot.lane.b32.xlu2 %v2837_v37, %s2476_s28  ;;  %v1256_v37 = vld [vmem:[%s3093_s7 + $0x68] sm:$0xff] }
 0x305   : > { %1822 = vperm.xlu0 %2459, %v1255_v61   ;;  %1549 = vmatmul.bf16.vlgmr.msrb.gmra.mxu1 %v2413_v33  ;;  %v2436_v61 = vld [vmem:[%s3092_s6 + $0xb8] sm:$0xff] }
 0x30c   : > { %1817 = vperm.xlu1 %2457, %v1254_v12   ;;  %1348 = vrot.lane.b32.xlu2 %v2833_v48, %s2476_s28  ;;  %v1248_v48 = vld [vmem:[%s3093_s7 + $0x28] sm:$0xff] }
 0x30d   : > { %1807 = vperm.xlu0 %2459, %v1252_v63   ;;  %v2428_v63 = vld [vmem:[%s3092_s6 + $0x38] sm:$0xff] }
 0x314   : > { %1802 = vperm.xlu1 %2457, %v1251_v5   ;;  %1827 = vperm.xlu2 %2458, %v1256_v37  }
 0x315   : > { %1792 = vperm.xlu0 %2459, %v1249_v6   ;;  %1554 = vmatmul.bf16.gmra.mxu1 %v2414_v42 }
 0x31c   : > { %1787 = vperm.xlu1 %2457, %v1248_v48   ;;  %1812 = vperm.xlu2 %2458, %v1253_v11  }
 0x31d   : > { %1777 = vperm.xlu0 %2459, %v1246_v17  }
 0x324   : > { %1772 = vperm.xlu1 %2457, %v1245_v18   ;;  %1797 = vperm.xlu2 %2458, %v1250_v19  }
 0x325   : > { %1762 = vperm.xlu0 %2459, %v1243_v20   ;;  %1559 = vmatmul.bf16.gmra.mxu1 %v2415_v47 }
 0x326   : > { %v1616_v31 = vpop.permute.xlu1 %1615 }
 0x327   : > { %v1636_v36 = vsel %vm989_vm5, %v1616_v31, 0 }
 0x32c   : > { %1878 = vperm.xlu1 %2457, %v2460_v21   ;;  %1782 = vperm.xlu2 %2458, %v1247_v7  }
 0x32d   : > { %1958 = vperm.xlu0 %2459, %v1955_v22  }
 0x334   : > { %1767 = vperm.xlu2 %2458, %v1244_v23  }
 0x335   : > { %1564 = vmatmul.bf16.gmra.mxu1 %v2416_v52 }
 0x33c   : > { %1908 = vperm.xlu2 %2458, %v1905_v25  }
 0x33e   : > { %v1622_v26 = vpop.permute.xlu2 %1621 }
 0x33f   : > { %v1645_v24 = vsel %vm989_vm5, %v1622_v26, 0 }
 0x340   : > { %1695 = vmatpush.bf16.msrb.mxu2 %v1645_v24 }
 0x345   : > { %1569 = vmatmul.bf16.gmra.mxu1 %v2417_v53 }
 0x346   : > { %v1618_v28 = vpop.permute.xlu2 %1617  ;;  %v1620_v29 = vpop.permute.xlu0 %1619 }
 0x347   : > { %v1642_v27 = vsel %vm989_vm5, %v1620_v29, 0  ;;  %v1639_v30 = vsel %vm989_vm5, %v1618_v28, 0 }
 0x348   : > { %1696 = vmatpush.bf16.msrb.mxu2 %v1642_v27 }
 0x34c   : > { %1697 = vmatpush.bf16.msrb.mxu2 %v1639_v30 }
 0x34e   : > { %v1361_v34 = vpop.permute.xlu0 %1360  ;;  %v1359_v35 = vpop.permute.xlu2 %1358 }
 0x350   : > { %1698 = vmatpush.bf16.msrb.mxu2 %v1636_v36 }
 0x355   : > { %1574 = vmatmul.bf16.gmra.mxu1 %v2418_v56 }
 0x356   : > { %v1363_v38 = vpop.permute.xlu1 %1362  ;;  %v1612_v40 = vpop.permute.xlu2 %1611 }
 0x357   : > { %v1614_v1 = vpop.permute.xlu0 %1613  ;;  %2291 = vmatpush.bf16.msk.msra.mxu0 %vm2705_vm4, %v1363_v38  ;;  %v1630_v41 = vsel %vm989_vm5, %v1612_v40, 0 }
 0x358   : > { %v1633_v39 = vsel %vm989_vm5, %v1614_v1, 0 }
 0x359   : > { %1699 = vmatpush.bf16.msrb.mxu2 %v1633_v39 }
 0x35b   : > { %2293 = vmatpush.bf16.msk.msra.mxu0 %vm2705_vm4, %v1361_v34 }
 0x35d   : > { %1700 = vmatpush.bf16.msrb.mxu2 %v1630_v41 }
 0x35e   : > { %v1357_v0 = vpop.permute.xlu1 %1356  ;;  %v1353_v44 = vpop.permute.xlu2 %1352 }
 0x35f   : > { %v1355_v4 = vpop.permute.xlu0 %1354  ;;  %2295 = vmatpush.bf16.msk.msra.mxu0 %vm2705_vm4, %v1359_v35 }
 0x363   : > { %2297 = vmatpush.bf16.msk.msra.mxu0 %vm2705_vm4, %v1357_v0 }
 0x365   : > { %1579 = vmatmul.bf16.gmra.mxu1 %v2419_v58 }
 0x366   : > { %v1610_v43 = vpop.permute.xlu1 %1609  ;;  %v1349_v49 = vpop.permute.xlu2 %1348 }
 0x367   : > { %2299 = vmatpush.bf16.msk.msra.mxu0 %vm2705_vm4, %v1355_v4  ;;  %v1627_v15 = vsel %vm989_vm5, %v1610_v43, 0  ;;  %v1608_v2 = vpop.permute.xlu0 %1607 }
 0x368   : > { %1701 = vmatpush.bf16.msrb.mxu2 %v1627_v15  ;;  %v1624_v45 = vsel %vm989_vm5, %v1608_v2, 0 }
 0x36b   : > { %2301 = vmatpush.bf16.msk.msra.mxu0 %vm2705_vm4, %v1353_v44 }
 0x36c   : > { %1702 = vmatpush.bf16.msrb.mxu2 %v1624_v45 }
 0x36e   : > { %v1351_v9 = vpop.permute.xlu1 %1350 }
 0x36f   : > { %2303 = vmatpush.bf16.msk.msra.mxu0 %vm2705_vm4, %v1351_v9  ;;  %1703 = vmatmul.bf16.vlgmr.msrb.gmra.mxu2 %v2429_v46 }
 0x373   : > { %2305 = vmatpush.bf16.msk.msra.mxu0 %vm2705_vm4, %v1349_v49 }
 0x375   : > { %1584 = vmatmul.bf16.gmra.mxu1 %v2420_v3  ;;  %v1838_v3 = vpop.permute.xlu0 %1837 }
 0x376   : > { %1444 = vmatmul.bf16.vlgmr.msra.gmra.mxu0 %v2421_v50 }
 0x37f   : > { %1708 = vmatmul.bf16.gmra.mxu2 %v2430_v51 }
 0x382   : > { %v1550_v55 = vpop.f32.mrf.mxu1 }
 0x386   : > { %1449 = vmatmul.bf16.gmra.mxu0 %v2422_v62 }
 0x38a   : > { %v1552_v12 = vpop.f32.mrf.mxu1 }
 0x38f   : > { %1713 = vmatmul.bf16.gmra.mxu2 %v2431_v32 }
 0x392   : > { %v1555_v5 = vpop.f32.mrf.mxu1 }
 0x396   : > { %1454 = vmatmul.bf16.gmra.mxu0 %v2423_v54 }
 0x39a   : > { %v1557_v48 = vpop.f32.mrf.mxu1 }
 0x39f   : > { %1718 = vmatmul.bf16.gmra.mxu2 %v2432_v8 }
 0x3a2   : > { %v1560_v21 = vpop.f32.mrf.mxu1 }
 0x3a6   : > { %1459 = vmatmul.bf16.gmra.mxu0 %v2424_v57 }
 0x3aa   : > { %v1562_v24 = vpop.f32.mrf.mxu1 }
 0x3af   : > { %1723 = vmatmul.bf16.gmra.mxu2 %v2433_v14 }
 0x3b2   : > { %v1565_v31 = vpop.f32.mrf.mxu1 }
 0x3b6   : > { %1464 = vmatmul.bf16.gmra.mxu0 %v2425_v59 }
 0x3ba   : > { %v1567_v39 = vpop.f32.mrf.mxu1 }
 0x3bf   : > { %1728 = vmatmul.bf16.gmra.mxu2 %v2434_v60 }
 0x3c2   : > { %v1570_v43 = vpop.f32.mrf.mxu1 }
 0x3c6   : > { %1469 = vmatmul.bf16.gmra.mxu0 %v2426_v10 }
 0x3ca   : > { %v1572_v47 = vpop.f32.mrf.mxu1 }
 0x3cf   : > { %1733 = vmatmul.bf16.gmra.mxu2 %v2435_v16 }
 0x3d2   : > { %v1575_v52 = vpop.f32.mrf.mxu1 }
 0x3d6   : > { %1474 = vmatmul.bf16.gmra.mxu0 %v2427_v13  ;;  %v1833_v13 = vpop.permute.xlu1 %1832 }
 0x3da   : > { %v1577_v8 = vpop.f32.mrf.mxu1 }
 0x3df   : > { %1738 = vmatmul.bf16.gmra.mxu2 %v2436_v61 }
 0x3e2   : > { %v1580_v14 = vpop.f32.mrf.mxu1 }
 0x3e6   : > { %1479 = vmatmul.bf16.gmra.mxu0 %v2428_v63 }
 0x3ea   : > { %v1582_v60 = vpop.f32.mrf.mxu1 }
 0x3f2   : > { %v1704_v37 = vpop.f32.mrf.mxu2  ;;  %v1585_v61 = vpop.f32.mrf.mxu1 }
 0x3f3   : > { %v1445_v6 = vpop.f32.mrf.mxu0 }
 0x3f4   : > { %v1551_v11 = vadd.f32 %v1550_v55, %v1445_v6  ;;  %v1828_v55 = vpop.permute.xlu2 %1827  ;;  %v1818_v6 = vpop.permute.xlu1 %1817 }
 0x3f6   : > { %v3033_v17 = vadd.f32 %v1704_v37, %v1551_v11 }
 0x3fa   : > { %v1706_v18 = vpop.f32.mrf.mxu2 }
 0x3fb   : > { %v1447_v19 = vpop.f32.mrf.mxu0 }
 0x3fc   : > { %v1553_v20 = vadd.f32 %v1552_v12, %v1447_v19  ;;  %v1823_v12 = vpop.permute.xlu0 %1822 }
 0x3fe   : > { %v3035_v7 = vadd.f32 %v1706_v18, %v1553_v20  ;;  %v1587_v18 = vpop.f32.mrf.mxu1 }
 0x402   : > { %v1709_v22 = vpop.f32.mrf.mxu2 }
 0x403   : > { %v1450_v23 = vpop.f32.mrf.mxu0 }
 0x404   : > { %v1556_v25 = vadd.f32 %v1555_v5, %v1450_v23  ;;  %v1808_v23 = vpop.permute.xlu0 %1807 }
 0x406   : > { %v3037_v26 = vadd.f32 %v1709_v22, %v1556_v25 }
 0x40a   : > { %v1711_v28 = vpop.f32.mrf.mxu2 }
 0x40b   : > { %v1452_v29 = vpop.f32.mrf.mxu0 }
 0x40c   : > { %v1558_v27 = vadd.f32 %v1557_v48, %v1452_v29  ;;  %v1813_v48 = vpop.permute.xlu2 %1812 }
 0x40e   : > { %v3039_v30 = vadd.f32 %v1711_v28, %v1558_v27 }
 0x412   : > { %v1714_v33 = vpop.f32.mrf.mxu2 }
 0x413   : > { %v1455_v34 = vpop.f32.mrf.mxu0 }
 0x414   : > { %v1561_v35 = vadd.f32 %v1560_v21, %v1455_v34 }
 0x416   : > { %v3041_v36 = vadd.f32 %v1714_v33, %v1561_v35 }
 0x41a   : > { %v1716_v38 = vpop.f32.mrf.mxu2 }
 0x41b   : > { %v1457_v1 = vpop.f32.mrf.mxu0 }
 0x41c   : > { %v1563_v40 = vadd.f32 %v1562_v24, %v1457_v1 }
 0x41e   : > { %v3043_v41 = vadd.f32 %v1716_v38, %v1563_v40  ;;  %v1803_v40 = vpop.permute.xlu1 %1802 }
 0x422   : > { %v1719_v42 = vpop.f32.mrf.mxu2 }
 0x423   : > { %v1460_v0 = vpop.f32.mrf.mxu0 }
 0x424   : > { %v1566_v4 = vadd.f32 %v1565_v31, %v1460_v0 }
 0x426   : > { %v3045_v15 = vadd.f32 %v1719_v42, %v1566_v4 }
 0x42a   : > { %v1721_v44 = vpop.f32.mrf.mxu2 }
 0x42b   : > { %v1462_v2 = vpop.f32.mrf.mxu0 }
 0x42c   : > { %v1568_v45 = vadd.f32 %v1567_v39, %v1462_v2 }
 0x42e   : > { %v3047_v46 = vadd.f32 %v1721_v44, %v1568_v45 }
 0x432   : > { %v1724_v9 = vpop.f32.mrf.mxu2 }
 0x433   : > { %v1465_v49 = vpop.f32.mrf.mxu0 }
 0x434   : > { %v1571_v50 = vadd.f32 %v1570_v43, %v1465_v49  ;;  %v1798_v43 = vpop.permute.xlu2 %1797 }
 0x436   : > { %v3049_v51 = vadd.f32 %v1724_v9, %v1571_v50  ;;  %v1793_v9 = vpop.permute.xlu0 %1792 }
 0x43a   : > { %v1726_v62 = vpop.f32.mrf.mxu2 }
 0x43b   : > { %v1467_v32 = vpop.f32.mrf.mxu0 }
 0x43c   : > { %v1573_v35 = vadd.f32 %v1572_v47, %v1467_v32 }
 0x43e   : > { %v1753_v44 = vadd.f32 %v1726_v62, %v1573_v35  ;;  %v1783_v62 = vpop.permute.xlu2 %1782 }
 0x440   : > { %v1849_v47 = vadd.f32 %v1808_v23, %v1753_v44 }
 0x442   : > { %v1729_v53 = vpop.f32.mrf.mxu2 }
 0x443   : > { %v1470_v54 = vpop.f32.mrf.mxu0 }
 0x444   : > { %v1576_v27 = vadd.f32 %v1575_v52, %v1470_v54  ;;  %v1848_v54 = vadd.f32 %v1803_v40, %v3049_v51 }
 0x446   : > { %v1754_v42 = vadd.f32 %v1729_v53, %v1576_v27  ;;  %v1788_v53 = vpop.permute.xlu1 %1787  ;;  %v1937_v27 = vld [vmem:[%s483_s22] sm:$0x7] }
 0x448   : > { %v1850_v50 = vadd.f32 %v1813_v48, %v1754_v42 }
 0x44a   : > { %v1731_v56 = vpop.f32.mrf.mxu2  ;;  %v1866_v32 = vmax.f32 %v1850_v50, 0.0 }
 0x44b   : > { %v1472_v57 = vpop.f32.mrf.mxu0 }
 0x44c   : > { %v1578_v24 = vadd.f32 %v1577_v8, %v1472_v57  ;;  %v1865_v8 = vmax.f32 %v1849_v47, 0.0  ;;  %v1864_v57 = vmax.f32 %v1848_v54, 0.0 }
 0x44e   : > { %v1755_v38 = vadd.f32 %v1731_v56, %v1578_v24  ;;  %v1847_v56 = vadd.f32 %v1798_v43, %v3047_v46 }
 0x450   : > { %v1851_v45 = vadd.f32 %v1818_v6, %v1755_v38 }
 0x452   : > { %v1734_v58 = vpop.f32.mrf.mxu2  ;;  %v1867_v52 = vmax.f32 %v1851_v45, 0.0 }
 0x453   : > { %v1475_v59 = vpop.f32.mrf.mxu0 }
 0x454   : > { %v1581_v20 = vadd.f32 %v1580_v14, %v1475_v59  ;;  %v1846_v14 = vadd.f32 %v1793_v9, %v3045_v15  ;;  %v1863_v59 = vmax.f32 %v1847_v56, 0.0 }
 0x456   : > { %v1756_v31 = vadd.f32 %v1734_v58, %v1581_v20  ;;  %v1778_v58 = vpop.permute.xlu0 %1777 }
 0x458   : > { %v1852_v4 = vadd.f32 %v1823_v12, %v1756_v31 }
 0x45a   : > { %v1736_v10 = vpop.f32.mrf.mxu2  ;;  %v1868_v49 = vmax.f32 %v1852_v4, 0.0 }
 0x45b   : > { %v1477_v16 = vpop.f32.mrf.mxu0 }
 0x45c   : > { %v1583_v11 = vadd.f32 %v1582_v60, %v1477_v16  ;;  %v1845_v60 = vadd.f32 %v1788_v53, %v3043_v41  ;;  %v1843_v16 = vadd.f32 %v1778_v58, %v3039_v30  ;;  %v1872_v30 = vld [vmem:[%s3094_s8] sm:$0xff] }
 0x45e   : > { %v1757_v28 = vadd.f32 %v1736_v10, %v1583_v11  ;;  %v1844_v10 = vadd.f32 %v1783_v62, %v3041_v36  ;;  %v1861_v51 = vmax.f32 %v1845_v60, 0.0  ;;  %v1859_v15 = vmax.f32 %v1843_v16, 0.0 }
 0x460   : > { %v1853_v39 = vadd.f32 %v1828_v55, %v1757_v28  ;;  %v1860_v46 = vmax.f32 %v1844_v10, 0.0 }
 0x462   : > { %v1739_v63 = vpop.f32.mrf.mxu2  ;;  %v1869_v2 = vmax.f32 %v1853_v39, 0.0 }
 0x463   : > { %v1480_v5 = vpop.f32.mrf.mxu0 }
 0x464   : > { %v1586_v37 = vadd.f32 %v1585_v61, %v1480_v5  ;;  %v1768_v61 = vpop.permute.xlu2 %1767 }
 0x465   : > { %v1841_v12 = vadd.f32 %v1768_v61, %v3035_v7  ;;  %v1873_v7 = vld [vmem:[%s3094_s8 + $0x8] sm:$0xff] }
 0x466   : > { %v1758_v21 = vadd.f32 %v1739_v63, %v1586_v37  ;;  %v1763_v63 = vpop.permute.xlu0 %1762 }
 0x467   : > { %v1840_v5 = vadd.f32 %v1763_v63, %v3033_v17  ;;  %v1857_v36 = vmax.f32 %v1841_v12, 0.0 }
 0x468   : > { %v1854_v34 = vadd.f32 %v1833_v13, %v1758_v21  ;;  %v1773_v13 = vpop.permute.xlu1 %1772 }
 0x469   : > { %v1842_v55 = vadd.f32 %v1773_v13, %v3037_v26  ;;  %v1856_v37 = vmax.f32 %v1840_v5, 0.0 }
 0x46a   : > { %v1741_v25 = vpop.f32.mrf.mxu2  ;;  %v1870_v0 = vmax.f32 %v1854_v34, 0.0 }
 0x46b   : > { %v1482_v19 = vpop.f32.mrf.mxu0  ;;  %v1858_v41 = vmax.f32 %v1842_v55, 0.0 }
 0x46c   : > { %v1588_v22 = vadd.f32 %v1587_v18, %v1482_v19  ;;  %v1904_v18 = vld [vmem:[%s3096_s10] sm:$0x7]  ;;  %v1909_v19 = vpop.permute.xlu2 %1908 }
 0x46e   : > { %v1759_v29 = vadd.f32 %v1741_v25, %v1588_v22  ;;  %v1959_v4 = vpop.permute.xlu0 %1958 }
 0x470   : > { %v1855_v33 = vadd.f32 %v1838_v3, %v1759_v29  ;;  %v1862_v3 = vmax.f32 %v1846_v14, 0.0  ;;  %v1879_v6 = vpop.permute.xlu1 %1878 }
 0x472   : > { %v1871_v1 = vmax.f32 %v1855_v33, 0.0 }
 0x474   : > { %1881 = vmatpush.msra.mxu3 %v1871_v1 }
 0x476   : > { %1882 = vmatpush.msra.mxu3 %v1870_v0 }
 0x478   : > { %1883 = vmatpush.msra.mxu3 %v1869_v2 }
 0x47a   : > { %1884 = vmatpush.msra.mxu3 %v1868_v49 }
 0x47c   : > { %1885 = vmatpush.msra.mxu3 %v1867_v52 }
 0x47e   : > { %1886 = vmatpush.msra.mxu3 %v1866_v32 }
 0x480   : > { %1887 = vmatpush.msra.mxu3 %v1865_v8 }
 0x482   : > { %1888 = vmatpush.msra.mxu3 %v1864_v57 }
 0x484   : > { %1889 = vmatpush.msra.mxu3 %v1863_v59 }
 0x486   : > { %1890 = vmatpush.msra.mxu3 %v1862_v3 }
 0x488   : > { %1891 = vmatpush.msra.mxu3 %v1861_v51 }
 0x48a   : > { %1892 = vmatpush.msra.mxu3 %v1860_v46 }
 0x48c   : > { %1893 = vmatpush.msra.mxu3 %v1859_v15 }
 0x48e   : > { %1894 = vmatpush.msra.mxu3 %v1858_v41 }
 0x490   : > { %1895 = vmatpush.msra.mxu3 %v1857_v36 }
 0x492   : > { %1896 = vmatpush.msra.mxu3 %v1856_v37 }
 0x493   : > { %1897 = vmatmul.f32.vlgmr.msra.gmra.mxu3 %v1872_v30 }
 0x49b   : > { %1900 = vmatmul.f32.gmra.mxu3 %v1873_v7 }
 0x516   : > { %v1898_v26 = vpop.f32.mrf.mxu3 }
 0x517   : > { %v1899_v11 = vadd.f32 %v1898_v26, %v1879_v6 }
 0x51e   : > { %v1901_v48 = vpop.f32.mrf.mxu3 }
 0x51f   : > { %v1902_v17 = vadd.f32 %v1901_v48, %v1879_v6 }
 0x521   : > { %1929 = vmatpush.msrb.mxu3 %v1902_v17 }
 0x523   : > { %1930 = vmatpush.msrb.mxu3 %v1899_v11 }
 0x524   : > { %2386 = vmatmul.msk.f32.vlgmr.msrb.gmra.mxu3 %vm1911_vm6, %v1904_v18 }
 0x5a7   : > { %v1932_v20 = vpop.f32.mrf.mxu3 }
 0x5a8   : > { %v1933_v21 = vadd.f32 %v1932_v20, %v1909_v19 }
 0x5aa   : > { %v1941_v22 = vand.u32 2147483647, %v1933_v21  ;;  %1936 = vst.msk [vmem:[%s487_s18] sm:$0x7] %vm1935_vm7, %v1933_v21  ;;  %v1938_v33 = vmax.f32 %v1933_v21, 0.0  ;;  %v1939_v34 = vmul.f32 %v1937_v27, %v1933_v21 }
 0x5ac   : > { %v1942_v23 = vsub.f32 0.0, %v1941_v22  ;;  %v1940_v40 = vsub.f32 %v1938_v33, %v1939_v34 }
 0x5ae   : > { %v1943_v25 = vmul.f32 1.442695, %v1942_v23 }
 0x5b0   : > { %2461 = vpow2.f32 %v1943_v25 }
 0x5b6   : > { %v2462_v24 = vpop.eup %2461 }
 0x5b7   : > { %v1945_v28 = vadd.f32 1.0, %v2462_v24  ;;  %v1948_v29 = vmul.f32 -0.5, %v2462_v24  ;;  %v1951_v35 = vand.u32 2147483647, %v2462_v24 }
 0x5b9   : > { %2463 = vlog2.f32 %v1945_v28  ;;  %v1949_v31 = vadd.f32 1.0, %v1948_v29  ;;  %vm1952_vm8 = vcmp.lt.f32.partialorder %v1951_v35, 0.0004427343 }
 0x5bb   : > { %v1950_v39 = vmul.f32 %v2462_v24, %v1949_v31 }
 0x5bf   : > { %v2464_v38 = vpop.eup %2463 }
 0x5c0   : > { %v1947_v1 = vmul.f32 0.6931472, %v2464_v38 }
 0x5c2   : > { %v1953_v42 = vsel %vm1952_vm8, %v1950_v39, %v1947_v1 }
 0x5c3   : > { %v1954_v0 = vadd.f32 %v1953_v42, %v1940_v40 }
 0x5c5   : > { %v1961_v43 = vmul.f32 %v1959_v4, %v1954_v0 }
 0x5c7   : > { %v1962_v44 = vsel %vm1935_vm7, %v1961_v43, 0.0 }
 0x5c8   : > { %1963 = vadd.xlane.f32.xlu1 %v1962_v44 }
 0x63b   : > { %v1964_v2 = vpop.xlane.xlu1 %1963 }
 0x63c   : > { %v1966_v45 = vsel %vm1965_vm9, %v1964_v2, 0.0 }
 0x63d   : > { %v1967_v9 = vrot.slane %v1966_v45, 4 }
 0x63f   : > { %v1968_v49 = vadd.f32 %v1967_v9, %v1966_v45 }
 0x641   : > { %v1969_v50 = vrot.slane %v1968_v49, 2 }
 0x643   : > { %v1970_v52 = vadd.f32 %v1969_v50, %v1968_v49 }
 0x645   : > { %v1971_v47 = vrot.slane %v1970_v52, 1 }
 0x647   : > { %v1972_v32 = vadd.f32 %v1971_v47, %v1970_v52 }
 0x649   : > { %1974 = vst.msk [vmem:[%s490_s24] sm:$0x1] %vm1973_vm10, %v1972_v32 }
 0x64a PF: > { %s27_s15 = sadd.s32 1, %s2471_s15  }
 0x64b   : > { %p24_p4 = scmp.ge.s32.totalorder %s27_s15, 4  }
 0x64d   :  { %26 = sbr.rel (!%p24_p4) target bundleno = 3 (0x3), region = 121 }

</bundles_post_ra>
